<compile_context>
chip_gen: v7x
topology: tpu7x:2x2x1
jax: 0.10.0
libtpu: 0.0.40
codegen_flags: <defaults>
</compile_context>

<pallas_src>
import math
import numpy as np
import jax
import jax.numpy as jnp
from jax.experimental import pallas as pl
from jax.experimental.pallas import tpu as pltpu


def make_mha_kernel(bt, seq_len, hidden_dim, n_heads, use_mask):
    head_dim = hidden_dim // n_heads
    rows = bt * seq_len

    def _proj(x_ref, w_ref, b_ref):
        # fp32 activations arrive straight from HBM; cast to bf16 on the VPU
        # right before the MXU, accumulate fp32, add bias, then immediately
        # drop back to bf16 so only bf16 intermediates stay live.
        x2 = x_ref[...].reshape(rows, hidden_dim).astype(jnp.bfloat16)
        y = jnp.dot(x2, w_ref[...], preferred_element_type=jnp.float32)
        y = y + b_ref[...]
        return y.astype(jnp.bfloat16).reshape(bt, seq_len, hidden_dim)

    def _attention(Q, K, V, Qs, Ks, mask3, wo_ref, bo_ref, x_ref, attn_ref):
        # Per-head batched (over bt) QK^T contracting the last dims: no
        # explicit transpose/relayout.  Q/K/V are already bf16.
        ctx_heads = []
        for h in range(n_heads):  # static loop -> static lane slices
            sl = slice(h * head_dim, (h + 1) * head_dim)
            Qh, Kh, Vh = Q[:, :, sl], K[:, :, sl], V[:, :, sl]

            energy = jnp.einsum("bqd,bkd->bqk", Qh, Kh,
                                preferred_element_type=jnp.float32)
            if use_mask:
                energy_s = jnp.einsum("bqd,bkd->bqk", Qs[:, :, sl], Ks[:, :, sl],
                                      preferred_element_type=jnp.float32)
                # energy.masked_fill(mask,0) + energy_side.masked_fill(mask==0,0)
                energy = jnp.where(mask3, energy_s, energy)

            # softmax along last axis (1/sqrt(head_dim) already folded in)
            m = jnp.max(energy, axis=-1, keepdims=True)
            e = jnp.exp(energy - m)
            s = jnp.sum(e, axis=-1, keepdims=True)
            attn = e * pl.reciprocal(s, approx=True)   # EUP slot, not VPU divide

            attn_ref[:, h, :, :] = attn.astype(attn_ref.dtype)
            ctx_heads.append(
                jnp.einsum("bqk,bkd->bqd", attn.astype(jnp.bfloat16), Vh,
                           preferred_element_type=jnp.float32))

        # single full-width fc_o matmul on the concatenated per-head contexts
        ctx = jnp.concatenate(ctx_heads, axis=-1).reshape(rows, hidden_dim)
        out = jnp.dot(ctx.astype(jnp.bfloat16), wo_ref[...],
                      preferred_element_type=jnp.float32) + bo_ref[...]
        x_ref[...] = out.reshape(bt, seq_len, hidden_dim)

    if use_mask:
        def kernel(q_ref, k_ref, qs_ref, ks_ref, v_ref,
                   wq_ref, bq_ref, wk_ref, bk_ref,
                   wqs_ref, bqs_ref, wks_ref, bks_ref,
                   wv_ref, bv_ref, wo_ref, bo_ref,
                   mask_ref, x_ref, attn_ref):
            Q = _proj(q_ref, wq_ref, bq_ref)
            K = _proj(k_ref, wk_ref, bk_ref)
            Qs = _proj(qs_ref, wqs_ref, bqs_ref)
            Ks = _proj(ks_ref, wks_ref, bks_ref)
            V = _proj(v_ref, wv_ref, bv_ref)
            mask3 = mask_ref[:, 0].astype(jnp.int32) != 0   # (bt, L, L) bool
            _attention(Q, K, V, Qs, Ks, mask3, wo_ref, bo_ref, x_ref, attn_ref)
        return kernel

    def kernel(q_ref, k_ref, v_ref,
               wq_ref, bq_ref, wk_ref, bk_ref,
               wv_ref, bv_ref, wo_ref, bo_ref,
               x_ref, attn_ref):
        # mask=None path: the side projections / energy_side are dead code and
        # skipped entirely (no wasted MXU work).
        Q = _proj(q_ref, wq_ref, bq_ref)
        K = _proj(k_ref, wk_ref, bk_ref)
        V = _proj(v_ref, wv_ref, bv_ref)
        _attention(Q, K, V, None, None, None, wo_ref, bo_ref, x_ref, attn_ref)
    return kernel


def _vmem_capacity_bytes():
    try:
        return int(pltpu.get_tpu_info().vmem_capacity_bytes)
    except Exception:
        return 64 * 1024 * 1024   # conservative fallback (v7x per-TC VMEM)


def _pick_batch_block(B, L, H, n_heads, use_mask, attn_bytes, budget):
    """Largest divisor of B that (a) leaves >=2 grid steps and (b) fits the
    per-step double-buffered VMEM budget for this chip generation."""
    n_act = 5 if use_mask else 3

    def est(bt):
        acts = n_act * bt * L * H * 4 * 2                      # fp32 inputs, 2x buffered
        msk = (bt * L * L * 1 * 2) if use_mask else 0          # int8 mask
        outs = (bt * L * H * 4 + bt * n_heads * L * L * attn_bytes) * 2
        wts = 6 * H * H * 2 + 6 * H * 4                        # resident bf16 weights
        live = (5 * bt * L * H * 2                             # bf16 projections
                + 4 * bt * L * L * 4                           # in-flight energies/attn
                + 2 * bt * L * H * 4)                          # ctx / fc_o accum
        return acts + msk + outs + wts + live

    bt = max(1, B // 2)            # >= 2 grid steps when B >= 2 (v7x: 2 TCs)
    while B % bt:
        bt -= 1
    while bt > 1 and est(bt) > budget:
        bt -= 1
        while B % bt:
            bt -= 1
    return bt


def mha_pallas(params, query, key, query_side, key_side, value, mask=None,
               *, batch_block=None, attn_dtype=jnp.float32):
    B, L, H = query.shape
    n_heads = params["n_heads"]
    head_dim = H // n_heads
    inv_scale = 1.0 / math.sqrt(head_dim)
    use_mask = mask is not None
    attn_bytes = jnp.dtype(attn_dtype).itemsize

    vmem_cap = _vmem_capacity_bytes()
    if batch_block is None:
        batch_block = _pick_batch_block(B, L, H, n_heads, use_mask, attn_bytes,
                                        budget=int(vmem_cap * 0.5))
    bt = batch_block
    assert B % bt == 0, "batch_block must divide batch"
    grid = (B // bt,)

    kernel = make_mha_kernel(bt, L, H, n_heads, use_mask)

    def w_t(name, scale=1.0):
        # pre-transposed (x @ W.T == x @ w_t), scale folded, bf16 for the MXU
        return (params["W" + name].T * scale).astype(jnp.bfloat16)

    def b_row(name, scale=1.0):
        return (params["b" + name] * scale)[None, :].astype(jnp.float32)

    act_spec = pl.BlockSpec((bt, L, H), lambda b: (b, 0, 0))
    w_spec = pl.BlockSpec((H, H), lambda b: (0, 0))
    b_spec = pl.BlockSpec((1, H), lambda b: (0, 0))
    mask_spec = pl.BlockSpec((bt, 1, L, L), lambda b: (b, 0, 0, 0))

    out_specs = (
        pl.BlockSpec((bt, L, H), lambda b: (b, 0, 0)),
        pl.BlockSpec((bt, n_heads, L, L), lambda b: (b, 0, 0, 0)),
    )
    out_shape = (
        jax.ShapeDtypeStruct((B, L, H), jnp.float32),
        jax.ShapeDtypeStruct((B, n_heads, L, L), attn_dtype),
    )

    # Advisory cost estimate so XLA schedules neighbors sensibly.
    n_proj = 5 if use_mask else 3
    flops = 2 * B * L * H * H * (n_proj + 1) \
        + (3 if use_mask else 2) * 2 * B * n_heads * L * L * head_dim
    transcendentals = B * n_heads * L * L
    bytes_accessed = (n_proj * B * L * H * 4
                      + (n_proj + 1) * (H * H * 2 + H * 4)
                      + (B * L * L if use_mask else 0)
                      + B * L * H * 4
                      + B * n_heads * L * L * attn_bytes)
    cost = pl.CostEstimate(flops=flops, transcendentals=transcendentals,
                           bytes_accessed=bytes_accessed)

    if use_mask:
        args = (
            query, key, query_side, key_side, value,      # fp32, cast in-kernel
            w_t("q", inv_scale), b_row("q", inv_scale),
            w_t("k"), b_row("k"),
            w_t("qs", inv_scale), b_row("qs", inv_scale),
            w_t("ks"), b_row("ks"),
            w_t("v"), b_row("v"),
            w_t("o"), b_row("o"),
            mask.astype(jnp.int8),                         # 1 B/elem mask DMA
        )
        in_specs = [act_spec] * 5 + [w_spec, b_spec] * 6 + [mask_spec]
    else:
        args = (
            query, key, value,
            w_t("q", inv_scale), b_row("q", inv_scale),
            w_t("k"), b_row("k"),
            w_t("v"), b_row("v"),
            w_t("o"), b_row("o"),
        )
        in_specs = [act_spec] * 3 + [w_spec, b_spec] * 4

    return pl.pallas_call(
        kernel,
        out_shape=out_shape,
        grid=grid,
        in_specs=in_specs,
        out_specs=out_specs,
        compiler_params=pltpu.CompilerParams(
            dimension_semantics=("parallel",),
            vmem_limit_bytes=int(vmem_cap * 0.85)),   # leave compiler headroom
        cost_estimate=cost,
    )(*args)


def mha_reference(params, query, key, query_side, key_side, value, mask=None):
    """Pure-JAX fp32 mirror of the PyTorch forward (eval-mode dropout)."""
    B, L, H = query.shape
    nH = params["n_heads"]
    hd = H // nH
    scale = math.sqrt(hd)

    def lin(x, W, b):
        return x @ W.T + b

    def split(x):
        return x.reshape(B, L, nH, hd).transpose(0, 2, 1, 3)

    Q = split(lin(query, params["Wq"], params["bq"]))
    K = split(lin(key, params["Wk"], params["bk"]))
    Qs = split(lin(query_side, params["Wqs"], params["bqs"]))
    Ks = split(lin(key_side, params["Wks"], params["bks"]))
    V = split(lin(value, params["Wv"], params["bv"]))

    energy = jnp.einsum("bhqd,bhkd->bhqk", Q, K) / scale
    energy_s = jnp.einsum("bhqd,bhkd->bhqk", Qs, Ks) / scale
    if mask is not None:
        m = mask.astype(bool)
        energy = jnp.where(m, energy_s, energy)
    attn = jax.nn.softmax(energy, axis=-1)
    x = jnp.einsum("bhqk,bhkd->bhqd", attn, V)
    x = x.transpose(0, 2, 1, 3).reshape(B, L, H)
    x = lin(x, params["Wo"], params["bo"])
    return x, attn


def init_params(key, hidden_dim, n_heads):
    bound = 1.0 / math.sqrt(hidden_dim)
    names = ["q", "k", "qs", "ks", "v", "o"]
    keys = jax.random.split(key, 2 * len(names))
    params = {"n_heads": n_heads}
    for i, n in enumerate(names):
        params[f"W{n}"] = jax.random.uniform(
            keys[2 * i], (hidden_dim, hidden_dim), jnp.float32, -bound, bound)
        params[f"b{n}"] = jax.random.uniform(
            keys[2 * i + 1], (hidden_dim,), jnp.float32, -bound, bound)
    return params


if __name__ == "__main__":
    B, L, H, n_heads = 2, 8, 32, 4

    root = jax.random.PRNGKey(0)
    kp, kq, kk, kqs, kks, kv, km = jax.random.split(root, 7)

    params = init_params(kp, H, n_heads)
    query = jax.random.normal(kq, (B, L, H), jnp.float32)
    key_ = jax.random.normal(kk, (B, L, H), jnp.float32)
    query_side = jax.random.normal(kqs, (B, L, H), jnp.float32)
    key_side = jax.random.normal(kks, (B, L, H), jnp.float32)
    value = jax.random.normal(kv, (B, L, H), jnp.float32)
    mask = jax.random.bernoulli(km, 0.3, (B, 1, L, L)).astype(jnp.int32)

    # masked path (fp32 attention output, exact module semantics)
    x_out, attn_out = mha_pallas(params, query, key_, query_side, key_side,
                                 value, mask)
    jax.block_until_ready((x_out, attn_out))
    x_ref, attn_ref = mha_reference(params, query, key_, query_side, key_side,
                                    value, mask)
    # bf16 MXU inputs + approx reciprocal -> bf16-level tolerance vs fp32 ref
    assert np.allclose(np.asarray(x_out), np.asarray(x_ref),
                       rtol=5e-2, atol=5e-2), "output mismatch (masked)"
    assert np.allclose(np.asarray(attn_out), np.asarray(attn_ref),
                       rtol=5e-2, atol=5e-2), "attention mismatch (masked)"

    # no-mask path, bf16 attention writeback (half the dominant store bytes)
    x_out2, attn_out2 = mha_pallas(params, query, key_, query_side, key_side,
                                   value, None, attn_dtype=jnp.bfloat16)
    jax.block_until_ready((x_out2, attn_out2))
    x_ref2, attn_ref2 = mha_reference(params, query, key_, query_side,
                                      key_side, value, None)
    assert np.allclose(np.asarray(x_out2), np.asarray(x_ref2),
                       rtol=5e-2, atol=5e-2), "output mismatch (no mask)"
    assert np.allclose(np.asarray(attn_out2, dtype=np.float32),
                       np.asarray(attn_ref2),
                       rtol=5e-2, atol=5e-2), "attention mismatch (no mask)"

    print("KERNEL_OK")
</pallas_src>

<mosaic_0001>
module attributes {stable_mosaic.version = 11 : i64} {
  func.func @kernel(%arg0: i32, %arg1: memref<1x8x32xf32, #tpu.memory_space<vmem>>, %arg2: memref<1x8x32xf32, #tpu.memory_space<vmem>>, %arg3: memref<1x8x32xf32, #tpu.memory_space<vmem>>, %arg4: memref<1x8x32xf32, #tpu.memory_space<vmem>>, %arg5: memref<1x8x32xf32, #tpu.memory_space<vmem>>, %arg6: memref<32x32xbf16, #tpu.memory_space<vmem>>, %arg7: memref<1x32xf32, #tpu.memory_space<vmem>>, %arg8: memref<32x32xbf16, #tpu.memory_space<vmem>>, %arg9: memref<1x32xf32, #tpu.memory_space<vmem>>, %arg10: memref<32x32xbf16, #tpu.memory_space<vmem>>, %arg11: memref<1x32xf32, #tpu.memory_space<vmem>>, %arg12: memref<32x32xbf16, #tpu.memory_space<vmem>>, %arg13: memref<1x32xf32, #tpu.memory_space<vmem>>, %arg14: memref<32x32xbf16, #tpu.memory_space<vmem>>, %arg15: memref<1x32xf32, #tpu.memory_space<vmem>>, %arg16: memref<32x32xbf16, #tpu.memory_space<vmem>>, %arg17: memref<1x32xf32, #tpu.memory_space<vmem>>, %arg18: memref<1x1x8x8xi8, #tpu.memory_space<vmem>>, %arg19: memref<1x8x32xf32, #tpu.memory_space<vmem>>, %arg20: memref<1x4x8x8xf32, #tpu.memory_space<vmem>>) attributes {dimension_semantics = [#tpu.dimension_semantics<parallel>], iteration_bounds = array<i64: 2>, scalar_prefetch = 0 : i64, scratch_operands = 0 : i64, tpu.core_type = #tpu.core_type<tc>, window_params = [{transform_indices = @transform_0, window_bounds = array<i64: 1, 8, 32>}, {transform_indices = @transform_1, window_bounds = array<i64: 1, 8, 32>}, {transform_indices = @transform_2, window_bounds = array<i64: 1, 8, 32>}, {transform_indices = @transform_3, window_bounds = array<i64: 1, 8, 32>}, {transform_indices = @transform_4, window_bounds = array<i64: 1, 8, 32>}, {pipeline_mode = #tpu.pipeline_mode<synchronous>, transform_indices = @transform_5, window_bounds = array<i64: 32, 32>}, {pipeline_mode = #tpu.pipeline_mode<synchronous>, transform_indices = @transform_6, window_bounds = array<i64: 1, 32>}, {pipeline_mode = #tpu.pipeline_mode<synchronous>, transform_indices = @transform_7, window_bounds = array<i64: 32, 32>}, {pipeline_mode = #tpu.pipeline_mode<synchronous>, transform_indices = @transform_8, window_bounds = array<i64: 1, 32>}, {pipeline_mode = #tpu.pipeline_mode<synchronous>, transform_indices = @transform_9, window_bounds = array<i64: 32, 32>}, {pipeline_mode = #tpu.pipeline_mode<synchronous>, transform_indices = @transform_10, window_bounds = array<i64: 1, 32>}, {pipeline_mode = #tpu.pipeline_mode<synchronous>, transform_indices = @transform_11, window_bounds = array<i64: 32, 32>}, {pipeline_mode = #tpu.pipeline_mode<synchronous>, transform_indices = @transform_12, window_bounds = array<i64: 1, 32>}, {pipeline_mode = #tpu.pipeline_mode<synchronous>, transform_indices = @transform_13, window_bounds = array<i64: 32, 32>}, {pipeline_mode = #tpu.pipeline_mode<synchronous>, transform_indices = @transform_14, window_bounds = array<i64: 1, 32>}, {pipeline_mode = #tpu.pipeline_mode<synchronous>, transform_indices = @transform_15, window_bounds = array<i64: 32, 32>}, {pipeline_mode = #tpu.pipeline_mode<synchronous>, transform_indices = @transform_16, window_bounds = array<i64: 1, 32>}, {transform_indices = @transform_17, window_bounds = array<i64: 1, 1, 8, 8>}, {transform_indices = @transform_18, window_bounds = array<i64: 1, 8, 32>}, {transform_indices = @transform_19, window_bounds = array<i64: 1, 4, 8, 8>}]} {
    %c0 = arith.constant 0 : index
    %c0_0 = arith.constant 0 : index
    %c0_1 = arith.constant 0 : index
    %0 = vector.load %arg1[%c0, %c0_0, %c0_1] : memref<1x8x32xf32, #tpu.memory_space<vmem>>, vector<1x8x32xf32>
    %1 = vector.shape_cast %0 : vector<1x8x32xf32> to vector<8x32xf32>
    %2 = arith.truncf %1 : vector<8x32xf32> to vector<8x32xbf16>
    %c0_2 = arith.constant 0 : index
    %c0_3 = arith.constant 0 : index
    %3 = vector.load %arg6[%c0_2, %c0_3] : memref<32x32xbf16, #tpu.memory_space<vmem>>, vector<32x32xbf16>
    %cst = arith.constant dense<0.000000e+00> : vector<8x32xf32>
    %4 = tpu.matmul %2, %3, %cst {dimension_numbers = #tpu.dot_dimension_numbers<[1], [0], [0], [1], [0, 0, 1, 1], [], []>} : vector<8x32xbf16>, vector<32x32xbf16>, vector<8x32xf32> -> vector<8x32xf32>
    %c0_4 = arith.constant 0 : index
    %c0_5 = arith.constant 0 : index
    %5 = vector.load %arg7[%c0_4, %c0_5] : memref<1x32xf32, #tpu.memory_space<vmem>>, vector<1x32xf32>
    %6 = vector.broadcast %5 : vector<1x32xf32> to vector<8x32xf32>
    %7 = arith.addf %4, %6 : vector<8x32xf32>
    %8 = arith.truncf %7 : vector<8x32xf32> to vector<8x32xbf16>
    %9 = vector.shape_cast %8 : vector<8x32xbf16> to vector<1x8x32xbf16>
    %c0_6 = arith.constant 0 : index
    %c0_7 = arith.constant 0 : index
    %c0_8 = arith.constant 0 : index
    %10 = vector.load %arg2[%c0_6, %c0_7, %c0_8] : memref<1x8x32xf32, #tpu.memory_space<vmem>>, vector<1x8x32xf32>
    %11 = vector.shape_cast %10 : vector<1x8x32xf32> to vector<8x32xf32>
    %12 = arith.truncf %11 : vector<8x32xf32> to vector<8x32xbf16>
    %c0_9 = arith.constant 0 : index
    %c0_10 = arith.constant 0 : index
    %13 = vector.load %arg8[%c0_9, %c0_10] : memref<32x32xbf16, #tpu.memory_space<vmem>>, vector<32x32xbf16>
    %cst_11 = arith.constant dense<0.000000e+00> : vector<8x32xf32>
    %14 = tpu.matmul %12, %13, %cst_11 {dimension_numbers = #tpu.dot_dimension_numbers<[1], [0], [0], [1], [0, 0, 1, 1], [], []>} : vector<8x32xbf16>, vector<32x32xbf16>, vector<8x32xf32> -> vector<8x32xf32>
    %c0_12 = arith.constant 0 : index
    %c0_13 = arith.constant 0 : index
    %15 = vector.load %arg9[%c0_12, %c0_13] : memref<1x32xf32, #tpu.memory_space<vmem>>, vector<1x32xf32>
    %16 = vector.broadcast %15 : vector<1x32xf32> to vector<8x32xf32>
    %17 = arith.addf %14, %16 : vector<8x32xf32>
    %18 = arith.truncf %17 : vector<8x32xf32> to vector<8x32xbf16>
    %19 = vector.shape_cast %18 : vector<8x32xbf16> to vector<1x8x32xbf16>
    %c0_14 = arith.constant 0 : index
    %c0_15 = arith.constant 0 : index
    %c0_16 = arith.constant 0 : index
    %20 = vector.load %arg3[%c0_14, %c0_15, %c0_16] : memref<1x8x32xf32, #tpu.memory_space<vmem>>, vector<1x8x32xf32>
    %21 = vector.shape_cast %20 : vector<1x8x32xf32> to vector<8x32xf32>
    %22 = arith.truncf %21 : vector<8x32xf32> to vector<8x32xbf16>
    %c0_17 = arith.constant 0 : index
    %c0_18 = arith.constant 0 : index
    %23 = vector.load %arg10[%c0_17, %c0_18] : memref<32x32xbf16, #tpu.memory_space<vmem>>, vector<32x32xbf16>
    %cst_19 = arith.constant dense<0.000000e+00> : vector<8x32xf32>
    %24 = tpu.matmul %22, %23, %cst_19 {dimension_numbers = #tpu.dot_dimension_numbers<[1], [0], [0], [1], [0, 0, 1, 1], [], []>} : vector<8x32xbf16>, vector<32x32xbf16>, vector<8x32xf32> -> vector<8x32xf32>
    %c0_20 = arith.constant 0 : index
    %c0_21 = arith.constant 0 : index
    %25 = vector.load %arg11[%c0_20, %c0_21] : memref<1x32xf32, #tpu.memory_space<vmem>>, vector<1x32xf32>
    %26 = vector.broadcast %25 : vector<1x32xf32> to vector<8x32xf32>
    %27 = arith.addf %24, %26 : vector<8x32xf32>
    %28 = arith.truncf %27 : vector<8x32xf32> to vector<8x32xbf16>
    %29 = vector.shape_cast %28 : vector<8x32xbf16> to vector<1x8x32xbf16>
    %c0_22 = arith.constant 0 : index
    %c0_23 = arith.constant 0 : index
    %c0_24 = arith.constant 0 : index
    %30 = vector.load %arg4[%c0_22, %c0_23, %c0_24] : memref<1x8x32xf32, #tpu.memory_space<vmem>>, vector<1x8x32xf32>
    %31 = vector.shape_cast %30 : vector<1x8x32xf32> to vector<8x32xf32>
    %32 = arith.truncf %31 : vector<8x32xf32> to vector<8x32xbf16>
    %c0_25 = arith.constant 0 : index
    %c0_26 = arith.constant 0 : index
    %33 = vector.load %arg12[%c0_25, %c0_26] : memref<32x32xbf16, #tpu.memory_space<vmem>>, vector<32x32xbf16>
    %cst_27 = arith.constant dense<0.000000e+00> : vector<8x32xf32>
    %34 = tpu.matmul %32, %33, %cst_27 {dimension_numbers = #tpu.dot_dimension_numbers<[1], [0], [0], [1], [0, 0, 1, 1], [], []>} : vector<8x32xbf16>, vector<32x32xbf16>, vector<8x32xf32> -> vector<8x32xf32>
    %c0_28 = arith.constant 0 : index
    %c0_29 = arith.constant 0 : index
    %35 = vector.load %arg13[%c0_28, %c0_29] : memref<1x32xf32, #tpu.memory_space<vmem>>, vector<1x32xf32>
    %36 = vector.broadcast %35 : vector<1x32xf32> to vector<8x32xf32>
    %37 = arith.addf %34, %36 : vector<8x32xf32>
    %38 = arith.truncf %37 : vector<8x32xf32> to vector<8x32xbf16>
    %39 = vector.shape_cast %38 : vector<8x32xbf16> to vector<1x8x32xbf16>
    %c0_30 = arith.constant 0 : index
    %c0_31 = arith.constant 0 : index
    %c0_32 = arith.constant 0 : index
    %40 = vector.load %arg5[%c0_30, %c0_31, %c0_32] : memref<1x8x32xf32, #tpu.memory_space<vmem>>, vector<1x8x32xf32>
    %41 = vector.shape_cast %40 : vector<1x8x32xf32> to vector<8x32xf32>
    %42 = arith.truncf %41 : vector<8x32xf32> to vector<8x32xbf16>
    %c0_33 = arith.constant 0 : index
    %c0_34 = arith.constant 0 : index
    %43 = vector.load %arg14[%c0_33, %c0_34] : memref<32x32xbf16, #tpu.memory_space<vmem>>, vector<32x32xbf16>
    %cst_35 = arith.constant dense<0.000000e+00> : vector<8x32xf32>
    %44 = tpu.matmul %42, %43, %cst_35 {dimension_numbers = #tpu.dot_dimension_numbers<[1], [0], [0], [1], [0, 0, 1, 1], [], []>} : vector<8x32xbf16>, vector<32x32xbf16>, vector<8x32xf32> -> vector<8x32xf32>
    %c0_36 = arith.constant 0 : index
    %c0_37 = arith.constant 0 : index
    %45 = vector.load %arg15[%c0_36, %c0_37] : memref<1x32xf32, #tpu.memory_space<vmem>>, vector<1x32xf32>
    %46 = vector.broadcast %45 : vector<1x32xf32> to vector<8x32xf32>
    %47 = arith.addf %44, %46 : vector<8x32xf32>
    %48 = arith.truncf %47 : vector<8x32xf32> to vector<8x32xbf16>
    %49 = vector.shape_cast %48 : vector<8x32xbf16> to vector<1x8x32xbf16>
    %c0_38 = arith.constant 0 : index
    %c0_39 = arith.constant 0 : index
    %c0_40 = arith.constant 0 : index
    %c0_41 = arith.constant 0 : index
    %50 = vector.load %arg18[%c0_38, %c0_39, %c0_40, %c0_41] : memref<1x1x8x8xi8, #tpu.memory_space<vmem>>, vector<1x1x8x8xi8>
    %51 = vector.shape_cast %50 : vector<1x1x8x8xi8> to vector<1x8x8xi8>
    %52 = arith.extsi %51 : vector<1x8x8xi8> to vector<1x8x8xi32>
    %c0_i32 = arith.constant 0 : i32
    %53 = vector.broadcast %c0_i32 : i32 to vector<1x8x8xi32>
    %54 = arith.cmpi ne, %52, %53 : vector<1x8x8xi32>
    %55 = vector.extract_strided_slice %9 {offsets = [0, 0, 0], sizes = [1, 8, 8], strides = [1, 1, 1]} : vector<1x8x32xbf16> to vector<1x8x8xbf16>
    %56 = vector.extract_strided_slice %19 {offsets = [0, 0, 0], sizes = [1, 8, 8], strides = [1, 1, 1]} : vector<1x8x32xbf16> to vector<1x8x8xbf16>
    %57 = vector.extract_strided_slice %49 {offsets = [0, 0, 0], sizes = [1, 8, 8], strides = [1, 1, 1]} : vector<1x8x32xbf16> to vector<1x8x8xbf16>
    "tpu.trace_start"() <{level = 10 : i32, message = "bqd,bkd->bqk"}> : () -> ()
    %cst_42 = arith.constant dense<0.000000e+00> : vector<1x8x8xf32>
    %58 = tpu.matmul %55, %56, %cst_42 {dimension_numbers = #tpu.dot_dimension_numbers<[2], [2], [1], [1], [0, 0, 0, 1, 1, 1], [0], [0]>} : vector<1x8x8xbf16>, vector<1x8x8xbf16>, vector<1x8x8xf32> -> vector<1x8x8xf32>
    "tpu.trace_stop"() : () -> ()
    %59 = vector.extract_strided_slice %29 {offsets = [0, 0, 0], sizes = [1, 8, 8], strides = [1, 1, 1]} : vector<1x8x32xbf16> to vector<1x8x8xbf16>
    %60 = vector.extract_strided_slice %39 {offsets = [0, 0, 0], sizes = [1, 8, 8], strides = [1, 1, 1]} : vector<1x8x32xbf16> to vector<1x8x8xbf16>
    "tpu.trace_start"() <{level = 10 : i32, message = "bqd,bkd->bqk"}> : () -> ()
    %cst_43 = arith.constant dense<0.000000e+00> : vector<1x8x8xf32>
    %61 = tpu.matmul %59, %60, %cst_43 {dimension_numbers = #tpu.dot_dimension_numbers<[2], [2], [1], [1], [0, 0, 0, 1, 1, 1], [0], [0]>} : vector<1x8x8xbf16>, vector<1x8x8xbf16>, vector<1x8x8xf32> -> vector<1x8x8xf32>
    "tpu.trace_stop"() : () -> ()
    %62 = arith.select %54, %61, %58 : vector<1x8x8xi1>, vector<1x8x8xf32>
    %cst_44 = arith.constant dense<0xFF800000> : vector<1x8xf32>
    %63 = vector.multi_reduction <maximumf>, %62, %cst_44 [2] : vector<1x8x8xf32> to vector<1x8xf32>
    %64 = vector.shape_cast %63 : vector<1x8xf32> to vector<1x8x1xf32>
    %65 = vector.broadcast %64 : vector<1x8x1xf32> to vector<1x8x8xf32>
    %66 = arith.subf %62, %65 : vector<1x8x8xf32>
    %67 = math.exp %66 : vector<1x8x8xf32>
    %cst_45 = arith.constant dense<0.000000e+00> : vector<1x8xf32>
    %68 = vector.multi_reduction <add>, %67, %cst_45 [2] : vector<1x8x8xf32> to vector<1x8xf32>
    %69 = vector.shape_cast %68 : vector<1x8xf32> to vector<1x8x1xf32>
    %70 = tpu.reciprocal %69 {approx = true} : vector<1x8x1xf32> -> vector<1x8x1xf32>
    %71 = vector.broadcast %70 : vector<1x8x1xf32> to vector<1x8x8xf32>
    %72 = arith.mulf %67, %71 : vector<1x8x8xf32>
    %c0_46 = arith.constant 0 : index
    %c0_47 = arith.constant 0 : index
    %c0_48 = arith.constant 0 : index
    %c0_49 = arith.constant 0 : index
    %73 = vector.load %arg20[%c0_46, %c0_47, %c0_48, %c0_49] : memref<1x4x8x8xf32, #tpu.memory_space<vmem>>, vector<1x1x8x8xf32>
    %74 = vector.shape_cast %73 : vector<1x1x8x8xf32> to vector<1x8x8xf32>
    %75 = vector.shape_cast %72 : vector<1x8x8xf32> to vector<1x1x8x8xf32>
    tpu.vector_store %arg20[%c0_46, %c0_47, %c0_48, %c0_49], %75 {strides = array<i32>} : memref<1x4x8x8xf32, #tpu.memory_space<vmem>>, vector<1x1x8x8xf32>,
    %76 = arith.truncf %72 : vector<1x8x8xf32> to vector<1x8x8xbf16>
    "tpu.trace_start"() <{level = 10 : i32, message = "bqk,bkd->bqd"}> : () -> ()
    %cst_50 = arith.constant dense<0.000000e+00> : vector<1x8x8xf32>
    %77 = tpu.matmul %76, %57, %cst_50 {dimension_numbers = #tpu.dot_dimension_numbers<[2], [1], [1], [2], [0, 0, 0, 1, 1, 2], [0], [0]>} : vector<1x8x8xbf16>, vector<1x8x8xbf16>, vector<1x8x8xf32> -> vector<1x8x8xf32>
    "tpu.trace_stop"() : () -> ()
    %78 = vector.extract_strided_slice %9 {offsets = [0, 0, 8], sizes = [1, 8, 8], strides = [1, 1, 1]} : vector<1x8x32xbf16> to vector<1x8x8xbf16>
    %79 = vector.extract_strided_slice %19 {offsets = [0, 0, 8], sizes = [1, 8, 8], strides = [1, 1, 1]} : vector<1x8x32xbf16> to vector<1x8x8xbf16>
    %80 = vector.extract_strided_slice %49 {offsets = [0, 0, 8], sizes = [1, 8, 8], strides = [1, 1, 1]} : vector<1x8x32xbf16> to vector<1x8x8xbf16>
    "tpu.trace_start"() <{level = 10 : i32, message = "bqd,bkd->bqk"}> : () -> ()
    %cst_51 = arith.constant dense<0.000000e+00> : vector<1x8x8xf32>
    %81 = tpu.matmul %78, %79, %cst_51 {dimension_numbers = #tpu.dot_dimension_numbers<[2], [2], [1], [1], [0, 0, 0, 1, 1, 1], [0], [0]>} : vector<1x8x8xbf16>, vector<1x8x8xbf16>, vector<1x8x8xf32> -> vector<1x8x8xf32>
    "tpu.trace_stop"() : () -> ()
    %82 = vector.extract_strided_slice %29 {offsets = [0, 0, 8], sizes = [1, 8, 8], strides = [1, 1, 1]} : vector<1x8x32xbf16> to vector<1x8x8xbf16>
    %83 = vector.extract_strided_slice %39 {offsets = [0, 0, 8], sizes = [1, 8, 8], strides = [1, 1, 1]} : vector<1x8x32xbf16> to vector<1x8x8xbf16>
    "tpu.trace_start"() <{level = 10 : i32, message = "bqd,bkd->bqk"}> : () -> ()
    %cst_52 = arith.constant dense<0.000000e+00> : vector<1x8x8xf32>
    %84 = tpu.matmul %82, %83, %cst_52 {dimension_numbers = #tpu.dot_dimension_numbers<[2], [2], [1], [1], [0, 0, 0, 1, 1, 1], [0], [0]>} : vector<1x8x8xbf16>, vector<1x8x8xbf16>, vector<1x8x8xf32> -> vector<1x8x8xf32>
    "tpu.trace_stop"() : () -> ()
    %85 = arith.select %54, %84, %81 : vector<1x8x8xi1>, vector<1x8x8xf32>
    %cst_53 = arith.constant dense<0xFF800000> : vector<1x8xf32>
    %86 = vector.multi_reduction <maximumf>, %85, %cst_53 [2] : vector<1x8x8xf32> to vector<1x8xf32>
    %87 = vector.shape_cast %86 : vector<1x8xf32> to vector<1x8x1xf32>
    %88 = vector.broadcast %87 : vector<1x8x1xf32> to vector<1x8x8xf32>
    %89 = arith.subf %85, %88 : vector<1x8x8xf32>
    %90 = math.exp %89 : vector<1x8x8xf32>
    %cst_54 = arith.constant dense<0.000000e+00> : vector<1x8xf32>
    %91 = vector.multi_reduction <add>, %90, %cst_54 [2] : vector<1x8x8xf32> to vector<1x8xf32>
    %92 = vector.shape_cast %91 : vector<1x8xf32> to vector<1x8x1xf32>
    %93 = tpu.reciprocal %92 {approx = true} : vector<1x8x1xf32> -> vector<1x8x1xf32>
    %94 = vector.broadcast %93 : vector<1x8x1xf32> to vector<1x8x8xf32>
    %95 = arith.mulf %90, %94 : vector<1x8x8xf32>
    %c0_55 = arith.constant 0 : index
    %c1 = arith.constant 1 : index
    %c0_56 = arith.constant 0 : index
    %c0_57 = arith.constant 0 : index
    %96 = vector.load %arg20[%c0_55, %c1, %c0_56, %c0_57] : memref<1x4x8x8xf32, #tpu.memory_space<vmem>>, vector<1x1x8x8xf32>
    %97 = vector.shape_cast %96 : vector<1x1x8x8xf32> to vector<1x8x8xf32>
    %98 = vector.shape_cast %95 : vector<1x8x8xf32> to vector<1x1x8x8xf32>
    tpu.vector_store %arg20[%c0_55, %c1, %c0_56, %c0_57], %98 {strides = array<i32>} : memref<1x4x8x8xf32, #tpu.memory_space<vmem>>, vector<1x1x8x8xf32>,
    %99 = arith.truncf %95 : vector<1x8x8xf32> to vector<1x8x8xbf16>
    "tpu.trace_start"() <{level = 10 : i32, message = "bqk,bkd->bqd"}> : () -> ()
    %cst_58 = arith.constant dense<0.000000e+00> : vector<1x8x8xf32>
    %100 = tpu.matmul %99, %80, %cst_58 {dimension_numbers = #tpu.dot_dimension_numbers<[2], [1], [1], [2], [0, 0, 0, 1, 1, 2], [0], [0]>} : vector<1x8x8xbf16>, vector<1x8x8xbf16>, vector<1x8x8xf32> -> vector<1x8x8xf32>
    "tpu.trace_stop"() : () -> ()
    %101 = vector.extract_strided_slice %9 {offsets = [0, 0, 16], sizes = [1, 8, 8], strides = [1, 1, 1]} : vector<1x8x32xbf16> to vector<1x8x8xbf16>
    %102 = vector.extract_strided_slice %19 {offsets = [0, 0, 16], sizes = [1, 8, 8], strides = [1, 1, 1]} : vector<1x8x32xbf16> to vector<1x8x8xbf16>
    %103 = vector.extract_strided_slice %49 {offsets = [0, 0, 16], sizes = [1, 8, 8], strides = [1, 1, 1]} : vector<1x8x32xbf16> to vector<1x8x8xbf16>
    "tpu.trace_start"() <{level = 10 : i32, message = "bqd,bkd->bqk"}> : () -> ()
    %cst_59 = arith.constant dense<0.000000e+00> : vector<1x8x8xf32>
    %104 = tpu.matmul %101, %102, %cst_59 {dimension_numbers = #tpu.dot_dimension_numbers<[2], [2], [1], [1], [0, 0, 0, 1, 1, 1], [0], [0]>} : vector<1x8x8xbf16>, vector<1x8x8xbf16>, vector<1x8x8xf32> -> vector<1x8x8xf32>
    "tpu.trace_stop"() : () -> ()
    %105 = vector.extract_strided_slice %29 {offsets = [0, 0, 16], sizes = [1, 8, 8], strides = [1, 1, 1]} : vector<1x8x32xbf16> to vector<1x8x8xbf16>
    %106 = vector.extract_strided_slice %39 {offsets = [0, 0, 16], sizes = [1, 8, 8], strides = [1, 1, 1]} : vector<1x8x32xbf16> to vector<1x8x8xbf16>
    "tpu.trace_start"() <{level = 10 : i32, message = "bqd,bkd->bqk"}> : () -> ()
    %cst_60 = arith.constant dense<0.000000e+00> : vector<1x8x8xf32>
    %107 = tpu.matmul %105, %106, %cst_60 {dimension_numbers = #tpu.dot_dimension_numbers<[2], [2], [1], [1], [0, 0, 0, 1, 1, 1], [0], [0]>} : vector<1x8x8xbf16>, vector<1x8x8xbf16>, vector<1x8x8xf32> -> vector<1x8x8xf32>
    "tpu.trace_stop"() : () -> ()
    %108 = arith.select %54, %107, %104 : vector<1x8x8xi1>, vector<1x8x8xf32>
    %cst_61 = arith.constant dense<0xFF800000> : vector<1x8xf32>
    %109 = vector.multi_reduction <maximumf>, %108, %cst_61 [2] : vector<1x8x8xf32> to vector<1x8xf32>
    %110 = vector.shape_cast %109 : vector<1x8xf32> to vector<1x8x1xf32>
    %111 = vector.broadcast %110 : vector<1x8x1xf32> to vector<1x8x8xf32>
    %112 = arith.subf %108, %111 : vector<1x8x8xf32>
    %113 = math.exp %112 : vector<1x8x8xf32>
    %cst_62 = arith.constant dense<0.000000e+00> : vector<1x8xf32>
    %114 = vector.multi_reduction <add>, %113, %cst_62 [2] : vector<1x8x8xf32> to vector<1x8xf32>
    %115 = vector.shape_cast %114 : vector<1x8xf32> to vector<1x8x1xf32>
    %116 = tpu.reciprocal %115 {approx = true} : vector<1x8x1xf32> -> vector<1x8x1xf32>
    %117 = vector.broadcast %116 : vector<1x8x1xf32> to vector<1x8x8xf32>
    %118 = arith.mulf %113, %117 : vector<1x8x8xf32>
    %c0_63 = arith.constant 0 : index
    %c2 = arith.constant 2 : index
    %c0_64 = arith.constant 0 : index
    %c0_65 = arith.constant 0 : index
    %119 = vector.load %arg20[%c0_63, %c2, %c0_64, %c0_65] : memref<1x4x8x8xf32, #tpu.memory_space<vmem>>, vector<1x1x8x8xf32>
    %120 = vector.shape_cast %119 : vector<1x1x8x8xf32> to vector<1x8x8xf32>
    %121 = vector.shape_cast %118 : vector<1x8x8xf32> to vector<1x1x8x8xf32>
    tpu.vector_store %arg20[%c0_63, %c2, %c0_64, %c0_65], %121 {strides = array<i32>} : memref<1x4x8x8xf32, #tpu.memory_space<vmem>>, vector<1x1x8x8xf32>,
    %122 = arith.truncf %118 : vector<1x8x8xf32> to vector<1x8x8xbf16>
    "tpu.trace_start"() <{level = 10 : i32, message = "bqk,bkd->bqd"}> : () -> ()
    %cst_66 = arith.constant dense<0.000000e+00> : vector<1x8x8xf32>
    %123 = tpu.matmul %122, %103, %cst_66 {dimension_numbers = #tpu.dot_dimension_numbers<[2], [1], [1], [2], [0, 0, 0, 1, 1, 2], [0], [0]>} : vector<1x8x8xbf16>, vector<1x8x8xbf16>, vector<1x8x8xf32> -> vector<1x8x8xf32>
    "tpu.trace_stop"() : () -> ()
    %124 = vector.extract_strided_slice %9 {offsets = [0, 0, 24], sizes = [1, 8, 8], strides = [1, 1, 1]} : vector<1x8x32xbf16> to vector<1x8x8xbf16>
    %125 = vector.extract_strided_slice %19 {offsets = [0, 0, 24], sizes = [1, 8, 8], strides = [1, 1, 1]} : vector<1x8x32xbf16> to vector<1x8x8xbf16>
    %126 = vector.extract_strided_slice %49 {offsets = [0, 0, 24], sizes = [1, 8, 8], strides = [1, 1, 1]} : vector<1x8x32xbf16> to vector<1x8x8xbf16>
    "tpu.trace_start"() <{level = 10 : i32, message = "bqd,bkd->bqk"}> : () -> ()
    %cst_67 = arith.constant dense<0.000000e+00> : vector<1x8x8xf32>
    %127 = tpu.matmul %124, %125, %cst_67 {dimension_numbers = #tpu.dot_dimension_numbers<[2], [2], [1], [1], [0, 0, 0, 1, 1, 1], [0], [0]>} : vector<1x8x8xbf16>, vector<1x8x8xbf16>, vector<1x8x8xf32> -> vector<1x8x8xf32>
    "tpu.trace_stop"() : () -> ()
    %128 = vector.extract_strided_slice %29 {offsets = [0, 0, 24], sizes = [1, 8, 8], strides = [1, 1, 1]} : vector<1x8x32xbf16> to vector<1x8x8xbf16>
    %129 = vector.extract_strided_slice %39 {offsets = [0, 0, 24], sizes = [1, 8, 8], strides = [1, 1, 1]} : vector<1x8x32xbf16> to vector<1x8x8xbf16>
    "tpu.trace_start"() <{level = 10 : i32, message = "bqd,bkd->bqk"}> : () -> ()
    %cst_68 = arith.constant dense<0.000000e+00> : vector<1x8x8xf32>
    %130 = tpu.matmul %128, %129, %cst_68 {dimension_numbers = #tpu.dot_dimension_numbers<[2], [2], [1], [1], [0, 0, 0, 1, 1, 1], [0], [0]>} : vector<1x8x8xbf16>, vector<1x8x8xbf16>, vector<1x8x8xf32> -> vector<1x8x8xf32>
    "tpu.trace_stop"() : () -> ()
    %131 = arith.select %54, %130, %127 : vector<1x8x8xi1>, vector<1x8x8xf32>
    %cst_69 = arith.constant dense<0xFF800000> : vector<1x8xf32>
    %132 = vector.multi_reduction <maximumf>, %131, %cst_69 [2] : vector<1x8x8xf32> to vector<1x8xf32>
    %133 = vector.shape_cast %132 : vector<1x8xf32> to vector<1x8x1xf32>
    %134 = vector.broadcast %133 : vector<1x8x1xf32> to vector<1x8x8xf32>
    %135 = arith.subf %131, %134 : vector<1x8x8xf32>
    %136 = math.exp %135 : vector<1x8x8xf32>
    %cst_70 = arith.constant dense<0.000000e+00> : vector<1x8xf32>
    %137 = vector.multi_reduction <add>, %136, %cst_70 [2] : vector<1x8x8xf32> to vector<1x8xf32>
    %138 = vector.shape_cast %137 : vector<1x8xf32> to vector<1x8x1xf32>
    %139 = tpu.reciprocal %138 {approx = true} : vector<1x8x1xf32> -> vector<1x8x1xf32>
    %140 = vector.broadcast %139 : vector<1x8x1xf32> to vector<1x8x8xf32>
    %141 = arith.mulf %136, %140 : vector<1x8x8xf32>
    %c0_71 = arith.constant 0 : index
    %c3 = arith.constant 3 : index
    %c0_72 = arith.constant 0 : index
    %c0_73 = arith.constant 0 : index
    %142 = vector.load %arg20[%c0_71, %c3, %c0_72, %c0_73] : memref<1x4x8x8xf32, #tpu.memory_space<vmem>>, vector<1x1x8x8xf32>
    %143 = vector.shape_cast %142 : vector<1x1x8x8xf32> to vector<1x8x8xf32>
    %144 = vector.shape_cast %141 : vector<1x8x8xf32> to vector<1x1x8x8xf32>
    tpu.vector_store %arg20[%c0_71, %c3, %c0_72, %c0_73], %144 {strides = array<i32>} : memref<1x4x8x8xf32, #tpu.memory_space<vmem>>, vector<1x1x8x8xf32>,
    %145 = arith.truncf %141 : vector<1x8x8xf32> to vector<1x8x8xbf16>
    "tpu.trace_start"() <{level = 10 : i32, message = "bqk,bkd->bqd"}> : () -> ()
    %cst_74 = arith.constant dense<0.000000e+00> : vector<1x8x8xf32>
    %146 = tpu.matmul %145, %126, %cst_74 {dimension_numbers = #tpu.dot_dimension_numbers<[2], [1], [1], [2], [0, 0, 0, 1, 1, 2], [0], [0]>} : vector<1x8x8xbf16>, vector<1x8x8xbf16>, vector<1x8x8xf32> -> vector<1x8x8xf32>
    "tpu.trace_stop"() : () -> ()
    %147 = tpu.concatenate %77, %100, %123, %146 in 2 : vector<1x8x8xf32>, vector<1x8x8xf32>, vector<1x8x8xf32>, vector<1x8x8xf32> -> vector<1x8x32xf32>
    %148 = vector.shape_cast %147 : vector<1x8x32xf32> to vector<8x32xf32>
    %149 = arith.truncf %148 : vector<8x32xf32> to vector<8x32xbf16>
    %c0_75 = arith.constant 0 : index
    %c0_76 = arith.constant 0 : index
    %150 = vector.load %arg16[%c0_75, %c0_76] : memref<32x32xbf16, #tpu.memory_space<vmem>>, vector<32x32xbf16>
    %cst_77 = arith.constant dense<0.000000e+00> : vector<8x32xf32>
    %151 = tpu.matmul %149, %150, %cst_77 {dimension_numbers = #tpu.dot_dimension_numbers<[1], [0], [0], [1], [0, 0, 1, 1], [], []>} : vector<8x32xbf16>, vector<32x32xbf16>, vector<8x32xf32> -> vector<8x32xf32>
    %c0_78 = arith.constant 0 : index
    %c0_79 = arith.constant 0 : index
    %152 = vector.load %arg17[%c0_78, %c0_79] : memref<1x32xf32, #tpu.memory_space<vmem>>, vector<1x32xf32>
    %153 = vector.broadcast %152 : vector<1x32xf32> to vector<8x32xf32>
    %154 = arith.addf %151, %153 : vector<8x32xf32>
    %155 = vector.shape_cast %154 : vector<8x32xf32> to vector<1x8x32xf32>
    %c0_80 = arith.constant 0 : index
    %c0_81 = arith.constant 0 : index
    %c0_82 = arith.constant 0 : index
    %156 = vector.load %arg19[%c0_80, %c0_81, %c0_82] : memref<1x8x32xf32, #tpu.memory_space<vmem>>, vector<1x8x32xf32>
    tpu.vector_store %arg19[%c0_80, %c0_81, %c0_82], %155 {strides = array<i32>} : memref<1x8x32xf32, #tpu.memory_space<vmem>>, vector<1x8x32xf32>,
    return
  }
  func.func @transform_0(%arg0: i32) -> (i32, i32, i32) {
    %c0_i32 = arith.constant 0 : i32
    %c0_i32_0 = arith.constant 0 : i32
    %c0_i32_1 = arith.constant 0 : i32
    return %arg0, %c0_i32, %c0_i32_0 : i32, i32, i32
  }
  func.func @transform_1(%arg0: i32) -> (i32, i32, i32) {
    %c0_i32 = arith.constant 0 : i32
    %c0_i32_0 = arith.constant 0 : i32
    %c0_i32_1 = arith.constant 0 : i32
    return %arg0, %c0_i32, %c0_i32_0 : i32, i32, i32
  }
  func.func @transform_2(%arg0: i32) -> (i32, i32, i32) {
    %c0_i32 = arith.constant 0 : i32
    %c0_i32_0 = arith.constant 0 : i32
    %c0_i32_1 = arith.constant 0 : i32
    return %arg0, %c0_i32, %c0_i32_0 : i32, i32, i32
  }
  func.func @transform_3(%arg0: i32) -> (i32, i32, i32) {
    %c0_i32 = arith.constant 0 : i32
    %c0_i32_0 = arith.constant 0 : i32
    %c0_i32_1 = arith.constant 0 : i32
    return %arg0, %c0_i32, %c0_i32_0 : i32, i32, i32
  }
  func.func @transform_4(%arg0: i32) -> (i32, i32, i32) {
    %c0_i32 = arith.constant 0 : i32
    %c0_i32_0 = arith.constant 0 : i32
    %c0_i32_1 = arith.constant 0 : i32
    return %arg0, %c0_i32, %c0_i32_0 : i32, i32, i32
  }
  func.func @transform_5(%arg0: i32) -> (i32, i32) {
    %c0_i32 = arith.constant 0 : i32
    %c0_i32_0 = arith.constant 0 : i32
    %c0_i32_1 = arith.constant 0 : i32
    return %c0_i32, %c0_i32_0 : i32, i32
  }
  func.func @transform_6(%arg0: i32) -> (i32, i32) {
    %c0_i32 = arith.constant 0 : i32
    %c0_i32_0 = arith.constant 0 : i32
    %c0_i32_1 = arith.constant 0 : i32
    return %c0_i32, %c0_i32_0 : i32, i32
  }
  func.func @transform_7(%arg0: i32) -> (i32, i32) {
    %c0_i32 = arith.constant 0 : i32
    %c0_i32_0 = arith.constant 0 : i32
    %c0_i32_1 = arith.constant 0 : i32
    return %c0_i32, %c0_i32_0 : i32, i32
  }
  func.func @transform_8(%arg0: i32) -> (i32, i32) {
    %c0_i32 = arith.constant 0 : i32
    %c0_i32_0 = arith.constant 0 : i32
    %c0_i32_1 = arith.constant 0 : i32
    return %c0_i32, %c0_i32_0 : i32, i32
  }
  func.func @transform_9(%arg0: i32) -> (i32, i32) {
    %c0_i32 = arith.constant 0 : i32
    %c0_i32_0 = arith.constant 0 : i32
    %c0_i32_1 = arith.constant 0 : i32
    return %c0_i32, %c0_i32_0 : i32, i32
  }
  func.func @transform_10(%arg0: i32) -> (i32, i32) {
    %c0_i32 = arith.constant 0 : i32
    %c0_i32_0 = arith.constant 0 : i32
    %c0_i32_1 = arith.constant 0 : i32
    return %c0_i32, %c0_i32_0 : i32, i32
  }
  func.func @transform_11(%arg0: i32) -> (i32, i32) {
    %c0_i32 = arith.constant 0 : i32
    %c0_i32_0 = arith.constant 0 : i32
    %c0_i32_1 = arith.constant 0 : i32
    return %c0_i32, %c0_i32_0 : i32, i32
  }
  func.func @transform_12(%arg0: i32) -> (i32, i32) {
    %c0_i32 = arith.constant 0 : i32
    %c0_i32_0 = arith.constant 0 : i32
    %c0_i32_1 = arith.constant 0 : i32
    return %c0_i32, %c0_i32_0 : i32, i32
  }
  func.func @transform_13(%arg0: i32) -> (i32, i32) {
    %c0_i32 = arith.constant 0 : i32
    %c0_i32_0 = arith.constant 0 : i32
    %c0_i32_1 = arith.constant 0 : i32
    return %c0_i32, %c0_i32_0 : i32, i32
  }
  func.func @transform_14(%arg0: i32) -> (i32, i32) {
    %c0_i32 = arith.constant 0 : i32
    %c0_i32_0 = arith.constant 0 : i32
    %c0_i32_1 = arith.constant 0 : i32
    return %c0_i32, %c0_i32_0 : i32, i32
  }
  func.func @transform_15(%arg0: i32) -> (i32, i32) {
    %c0_i32 = arith.constant 0 : i32
    %c0_i32_0 = arith.constant 0 : i32
    %c0_i32_1 = arith.constant 0 : i32
    return %c0_i32, %c0_i32_0 : i32, i32
  }
  func.func @transform_16(%arg0: i32) -> (i32, i32) {
    %c0_i32 = arith.constant 0 : i32
    %c0_i32_0 = arith.constant 0 : i32
    %c0_i32_1 = arith.constant 0 : i32
    return %c0_i32, %c0_i32_0 : i32, i32
  }
  func.func @transform_17(%arg0: i32) -> (i32, i32, i32, i32) {
    %c0_i32 = arith.constant 0 : i32
    %c0_i32_0 = arith.constant 0 : i32
    %c0_i32_1 = arith.constant 0 : i32
    %c0_i32_2 = arith.constant 0 : i32
    return %arg0, %c0_i32, %c0_i32_0, %c0_i32_1 : i32, i32, i32, i32
  }
  func.func @transform_18(%arg0: i32) -> (i32, i32, i32) {
    %c0_i32 = arith.constant 0 : i32
    %c0_i32_0 = arith.constant 0 : i32
    %c0_i32_1 = arith.constant 0 : i32
    return %arg0, %c0_i32, %c0_i32_0 : i32, i32, i32
  }
  func.func @transform_19(%arg0: i32) -> (i32, i32, i32, i32) {
    %c0_i32 = arith.constant 0 : i32
    %c0_i32_0 = arith.constant 0 : i32
    %c0_i32_1 = arith.constant 0 : i32
    %c0_i32_2 = arith.constant 0 : i32
    return %arg0, %c0_i32, %c0_i32_0, %c0_i32_1 : i32, i32, i32, i32
  }
}

</mosaic_0001>

<bundles_post_ra>
// kernel: tpu_custom_call.1
= control target key start
LH: loop header
LB: loop body
LE: loop exit
PB: predicated region body
PF: predicated region fallthrough
CT: control target
= control target key end

     0   :  { %s4028_s0 = inlined_call_operand.hbm [shape: f32[2,8,32], index: 0, kind: input, shape index: {}]   ;;  %s4029_s1 = inlined_call_operand.hbm [shape: f32[2,8,32], index: 1, kind: input, shape index: {}]   ;;  %s4030_s2 = inlined_call_operand.hbm [shape: f32[2,8,32], index: 2, kind: input, shape index: {}]   ;;  %s4031_s3 = inlined_call_operand.hbm [shape: f32[2,8,32], index: 3, kind: input, shape index: {}]   ;;  %s4032_s4 = inlined_call_operand.hbm [shape: f32[2,8,32], index: 4, kind: input, shape index: {}]   ;;  %s4033_s5 = inlined_call_operand.vmem [shape: bf16[32,32], index: 5, kind: input, shape index: {}]   ;;  %s4034_s6 = inlined_call_operand.vmem [shape: f32[1,32], index: 6, kind: input, shape index: {}]   ;;  %s4035_s7 = inlined_call_operand.hbm [shape: bf16[32,32], index: 7, kind: input, shape index: {}]   ;;  %s4036_s8 = inlined_call_operand.hbm [shape: f32[1,32], index: 8, kind: input, shape index: {}]   ;;  %s4037_s9 = inlined_call_operand.vmem [shape: bf16[32,32], index: 9, kind: input, shape index: {}]   ;;  %s4038_s10 = inlined_call_operand.hbm [shape: f32[1,32], index: 10, kind: input, shape index: {}]   ;;  %s4039_s11 = inlined_call_operand.hbm [shape: bf16[32,32], index: 11, kind: input, shape index: {}]   ;;  %s4040_s12 = inlined_call_operand.hbm [shape: f32[1,32], index: 12, kind: input, shape index: {}]   ;;  %s4041_s13 = inlined_call_operand.vmem [shape: bf16[32,32], index: 13, kind: input, shape index: {}]   ;;  %s4042_s14 = inlined_call_operand.hbm [shape: f32[1,32], index: 14, kind: input, shape index: {}]   ;;  %s4043_s15 = inlined_call_operand.hbm [shape: bf16[32,32], index: 15, kind: input, shape index: {}]   ;;  %s4044_s16 = inlined_call_operand.vmem [shape: f32[1,32], index: 16, kind: input, shape index: {}]   ;;  %s4045_s17 = inlined_call_operand.vmem [shape: s8[2,1,8,8], index: 17, kind: input, shape index: {}]   ;;  %s4046_s18 = inlined_call_operand.hbm [shape: f32[2,8,32], index: 18, kind: output, shape index: {0}]   ;;  %s4047_s19 = inlined_call_operand.hbm [shape: f32[2,4,8,8], index: 19, kind: output, shape index: {1}]  }
   0x1   :  { %4085 = sst [smem:[#allocation40_spill]] %s4028_s0 }
   0x2   :  { %4086 = sst [smem:[#allocation41_spill]] %s4029_s1 }
   0x3   :  { %4087 = sst [smem:[#allocation42_spill]] %s4030_s2 }
   0x4   :  { %4088 = sst [smem:[#allocation43_spill]] %s4031_s3 }
   0x5   :  { %4089 = sst [smem:[#allocation44_spill]] %s4032_s4 }
   0x6   :  { %4090 = sst [smem:[#allocation45_spill]] %s4033_s5 }
   0x7   :  { %4091 = sst [smem:[#allocation46_spill]] %s4034_s6 }
   0x8   :  { %4092 = sst [smem:[#allocation47_spill]] %s4035_s7 }
   0x9   :  { %4093 = sst [smem:[#allocation48_spill]] %s4036_s8 }
   0xa   :  { %4094 = sst [smem:[#allocation49_spill]] %s4037_s9 }
   0xb   :  { %4095 = sst [smem:[#allocation50_spill]] %s4038_s10 }
   0xc   :  { %4096 = sst [smem:[#allocation51_spill]] %s4040_s12 }
   0xd   :  { %4097 = sst [smem:[#allocation52_spill]] %s4041_s13 }
   0xe   :  { %4098 = sst [smem:[#allocation53_spill]] %s4044_s16 }
   0xf   :  { %4099 = sst [smem:[#allocation54_spill]] %s4045_s17 }
  0x10   :  { %4100 = sst [smem:[#allocation55_spill]] %s4046_s18 }
  0x11   :  { %4101 = sst [smem:[#allocation56_spill]] %s4047_s19 }
  0x12   :  { %25 = vsyncpa [#allocation3], 0 }
  0x13   :  { %27 = vsyncpa [#allocation3 + $0x1], 0 }
  0x14   :  { %28 = vsyncpa [#allocation6], 0 }
  0x15   :  { %30 = vsyncpa [#allocation6 + $0x1], 0 }
  0x16   :  { %31 = vsyncpa [#allocation9], 0 }
  0x17   :  { %33 = vsyncpa [#allocation9 + $0x1], 0 }
  0x18   :  { %34 = vsyncpa [#allocation12], 0 }
  0x19   :  { %35 = vsyncpa [#allocation15], 0 }
  0x1a   :  { %36 = vsyncpa [#allocation18], 0 }
  0x1b   :  { %37 = vsyncpa [#allocation21], 0 }
  0x1c   :  { %38 = vsyncpa [#allocation4], 0 }
  0x1d   :  { %40 = vsyncpa [#allocation4 + $0x1], 0 }
  0x1e   :  { %41 = vsyncpa [#allocation24], 0 }
  0x1f   :  { %43 = vsyncpa [#allocation24 + $0x1], 0  ;;  %s3288_s0 = smov 0   ;;  %s3290_s30 = smov 0  }
  0x20   :  { %s3292_s20 = smov 0   ;;  %s3294_s21 = smov 0  }
  0x21 LB: > { %4102 = sst [smem:[#allocation34_spill]] %s3149_s0  ;;  %s3163_s1 = smov [#allocation11]   ;;  %s3161_s21 = sphi %s3294_s21, %s4163_s21   ;;  %s3157_s20 = sphi %s3292_s20, %s4167_s20   ;;  %s3153_s30 = sphi %s3290_s30, %s4166_s30   ;;  %s3149_s0 = sphi %s3288_s0, %s4165_s0  }
  0x22   : > { %s532_s22 = sshll.u32 %s3163_s1, 4  ;;  %s3309_s2 = sadd.s32 4294967295, %s3161_s21   ;;  %s3314_s22 = int_to_ptr.vmem [resolvable:$true] %s532_s22 }
  0x23   : > { %4103 = sst [smem:[#allocation35_spill]] %s3309_s2  ;;  %p2268_p0 = scmp.ge.s32.totalorder %s3161_s21, 1 }
  0x24   : > { %p4065_p1 = scmp.eq.s32.totalorder %s3309_s2, 0  ;;  %p514_p2 = scmp.lt.s32.totalorder %s3161_s21, 3 }
  0x25   : > { %s3164_s24 = smov [#allocation14]   ;;  %s3165_s26 = smov [#allocation17]  }
  0x26   : > { %p3316_p3 = pnand %p2268_p0, %p514_p2  ;;  %s560_s25 = sshll.u32 %s3164_s24, 4  ;;  %s3329_s25 = int_to_ptr.vmem [resolvable:$true] %s560_s25 }
  0x27   : > { %s584_s27 = sshll.u32 %s3165_s26, 4  ;;  %s4106_s7 = sld [smem:[#allocation47_spill]]  ;;  %s3331_s27 = int_to_ptr.vmem [resolvable:$true] %s584_s27 }
  0x28   : > { %s4104_s23 = scalar_select %p3316_p3, 1, 0 }
  0x29   : > { %p2554_p5 = pneg %p3316_p3 }
  0x2b   : > { %p3325_p6 = pnand %p2554_p5, %p4065_p1 }
  0x2d   : > { %s4105_s3 = scalar_select %p3325_p6, 1, 0 }
  0x2e   : > { %s2693_s1 = scalar_lea.hbm %s4106_s7, 256  ;;  %p3341_p8 = pneg %p3325_p6 }
  0x2f   : > { %p2694_p7 = scmp.ne.s32.totalorder %s4106_s7, %s2693_s1  ;;  %p2700_p11 = scmp.lt.u32.totalorder %s2693_s1, %s4106_s7 }
  0x30   : > { %s4107_s24 = scalar_select %p3341_p8, 1, 0 }
  0x31   : > { %p2696_p9 = pnand %p3341_p8, %p2694_p7 }
  0x33   : > { %p2697_p10 = pneg %p2696_p9 }
  0x35   : > { %p2702_p12 = pnand %p2700_p11, %p2697_p10 }
  0x37   : > { %2705 = shalt.err (!%p2702_p12)
}
  0x38   : > { %s2706_s16 = scalar_lea.vmem %s3314_s22, 256  ;;  %p2714_p5 = scmp.lt.s32.totalorder %s3314_s22, %s3314_s22 }
  0x39   : > { %p2707_p13 = scmp.ne.s32.totalorder %s3314_s22, %s2706_s16  ;;  %p2715_p4 = scmp.lt.s32.totalorder %s2706_s16, %s2706_s16 }
  0x3b   : > { %p2709_p0 = pnand %p2707_p13, %p3341_p8  ;;  %p2716_p7 = por %p2715_p4, %p2714_p5 }
  0x3d   : > { %p2710_p2 = pneg %p2709_p0 }
  0x3f   : > { %p2717_p9 = pnand %p2716_p7, %p2710_p2 }
  0x41   : > { %2720 = shalt.err (!%p2717_p9)
}
  0x42   : > { %s4057_s18 = smov 64   ;;  %s4059_s19 = smov 4  }
  0x43   : > { %2557 = dma.hbm_to_vmem [thread:$0]  (!%p3325_p6), %s4106_s7, 256, %s3314_s22, [#allocation12], %s4057_s18, %s4057_s18, %s4059_s19  }
  0x44   : > { %s4108_s10 = sld [smem:[#allocation50_spill]] }
  0x4a   : > { %s2721_s16 = scalar_lea.hbm %s4108_s10, 16 }
  0x4b   : > { %p2722_p4 = scmp.ne.s32.totalorder %s4108_s10, %s2721_s16  ;;  %p2728_p12 = scmp.lt.u32.totalorder %s2721_s16, %s4108_s10 }
  0x4d   : > { %p2724_p10 = pnand %p2722_p4, %p3341_p8 }
  0x4f   : > { %p2725_p11 = pneg %p2724_p10 }
  0x51   : > { %p2730_p13 = pnand %p2728_p12, %p2725_p11 }
  0x53   : > { %2733 = shalt.err (!%p2730_p13)
}
  0x54   : > { %s2734_s22 = scalar_lea.vmem %s3329_s25, 16  ;;  %s2741_s6 = scalar_lea.vmem %s3329_s25, 32 }
  0x55   : > { %p2735_p0 = scmp.ne.s32.totalorder %s3329_s25, %s2734_s22  ;;  %p2742_p7 = scmp.lt.s32.totalorder %s3329_s25, %s3329_s25 }
  0x56   : > { %p2743_p9 = scmp.lt.s32.totalorder %s2741_s6, %s2734_s22 }
  0x57   : > { %p2737_p2 = pnand %p2735_p0, %p3341_p8 }
  0x58   : > { %p2744_p4 = por %p2743_p9, %p2742_p7 }
  0x59   : > { %p2738_p5 = pneg %p2737_p2 }
  0x5b   : > { %p2745_p10 = pnand %p2744_p4, %p2738_p5 }
  0x5d   : > { %2748 = shalt.err (!%p2745_p10)
}
  0x5e   : > { %2563 = dma.hbm_to_vmem [thread:$0]  (!%p3325_p6), %s4108_s10, 16, %s3329_s25, [#allocation15]  }
  0x5f   : > { %s4109_s12 = sld [smem:[#allocation51_spill]] }
  0x65   : > { %s2749_s29 = scalar_lea.hbm %s4109_s12, 16 }
  0x66   : > { %p2750_p11 = scmp.ne.s32.totalorder %s4109_s12, %s2749_s29  ;;  %p2756_p0 = scmp.lt.u32.totalorder %s2749_s29, %s4109_s12 }
  0x68   : > { %p2752_p12 = pnand %p2750_p11, %p3341_p8 }
  0x6a   : > { %p2753_p13 = pneg %p2752_p12 }
  0x6c   : > { %p2758_p2 = pnand %p2756_p0, %p2753_p13 }
  0x6e   : > { %2761 = shalt.err (!%p2758_p2)
}
  0x6f   : > { %s2762_s25 = scalar_lea.vmem %s3331_s27, 16  ;;  %s2769_s6 = scalar_lea.vmem %s3331_s27, 32 }
  0x70   : > { %p2763_p5 = scmp.ne.s32.totalorder %s3331_s27, %s2762_s25  ;;  %p2770_p4 = scmp.lt.s32.totalorder %s3331_s27, %s3331_s27 }
  0x71   : > { %p2771_p10 = scmp.lt.s32.totalorder %s2769_s6, %s2762_s25 }
  0x72   : > { %p2765_p7 = pnand %p2763_p5, %p3341_p8 }
  0x73   : > { %p2772_p11 = por %p2771_p10, %p2770_p4 }
  0x74   : > { %p2766_p9 = pneg %p2765_p7 }
  0x76   : > { %p2773_p12 = pnand %p2772_p11, %p2766_p9 }
  0x78   : > { %2776 = shalt.err (!%p2773_p12)
}
  0x79   : > { %2569 = dma.hbm_to_vmem [thread:$0]  (!%p3325_p6), %s4109_s12, 16, %s3331_s27, [#allocation18]  }
  0x7a   : > { %s2267_s17 = sadd.s32 4294967294, %s3161_s21   ;;  %s3415_s28 = sadd.s32 1, %s3161_s21  }
  0x7b   : > { %4110 = sst [smem:[#allocation36_spill]] %s3415_s28  ;;  %s56_s29 = sadd.s32 1, %s3157_s20 }
  0x7c   : > { %s53_s1 = ssub.s32 %s3161_s21, %s3415_s28  ;;  %p63_p13 = scmp.ne.s32.totalorder %s3157_s20, %s3153_s30 }
  0x7d   : > { %p54_p0 = scmp.eq.s32.totalorder %s53_s1, 0  ;;  %p64_p2 = scmp.eq.s32.totalorder %s3161_s21, 0 }
  0x7e   : > { %p69_p5 = scmp.ne.s32.totalorder %s3153_s30, %s3149_s0  ;;  %p475_p7 = scmp.eq.s32.totalorder %s3309_s2, 1 }
  0x7f   : > { %s3427_s26 = scalar_select %p54_p0, %s3157_s20, %s56_s29  }
  0x80   : > { %p65_p9 = por %p64_p2, %p63_p13  ;;  %p3431_p4 = por %p4065_p1, %p69_p5 }
  0x81   : > { %4111 = sst [smem:[#allocation37_spill]] %s3427_s26  ;;  %p3435_p10 = por %p475_p7, %p63_p13 }
  0x82   : > { %s4112_s27 = scalar_select %p3431_p4, 1, 0 }
  0x83   : > { %s4113_s16 = scalar_select %p3435_p10, 1, 0 }
  0x84   : > { %p481_p11 = scmp.eq.s32.totalorder %s2267_s17, 1  ;;  %p2606_p12 = scmp.lt.s32.totalorder %s3161_s21, 2 }
  0x85   : > { %4114 = sst [smem:[#allocation38_spill]] %s4113_s16  ;;  %s4061_s22 = sand.u32 1, %s3157_s20  }
  0x86   : > { %p3441_p3 = por %p481_p11, %p69_p5  ;;  %s3447_s6 = sshll.u32 %s4061_s22, 3 }
  0x87   : > { %s3450_s9 = sshll.u32 %s3161_s21, 7  ;;  %p3452_p0 = pnand %p2606_p12, %p65_p9 }
  0x88   : > { %s4115_s25 = scalar_select %p3441_p3, 1, 0 }
  0x89   : > { %s4117_s13 = scalar_select %p3452_p0, 1, 0 }
  0x8a   : > { %4116 = sst [smem:[#allocation39_spill]] %s4115_s25  ;;  %s4067_s29 = sand.u32 1, %s3161_s21  }
  0x8b   : > { %s4118_s18 = sld [smem:[#allocation41_spill]]  ;;  %s647_s22 = scalar_lea.vmem [#allocation5], %s3447_s6 }
  0x8c   : > { %s654_s7 = sshll.u32 %s647_s22, 4  ;;  %s3468_s10 = scalar_lea.sflag [#allocation6], %s4067_s29  ;;  %s3464_s7 = int_to_ptr.vmem [resolvable:$true] %s654_s7 }
  0x8d   : > { %p3474_p2 = pneg %p3452_p0 }
  0x8f   : > { %s4119_s26 = scalar_select %p3474_p2, 1, 0 }
  0x91   : > { %s3461_s19 = scalar_lea.hbm %s4118_s18, %s3450_s9  ;;  %s2782_s22 = scalar_lea.hbm %s4118_s18, 256 }
  0x92   : > { %s2777_s12 = scalar_lea.hbm %s3461_s19, 128  ;;  %p2783_p9 = scmp.lt.u32.totalorder %s3461_s19, %s4118_s18 }
  0x93   : > { %p2778_p13 = scmp.ne.s32.totalorder %s3461_s19, %s2777_s12  ;;  %p2784_p11 = scmp.lt.u32.totalorder %s2782_s22, %s2777_s12 }
  0x94   : > { %p2786_p1 = scmp.lt.u32.totalorder %s2777_s12, %s3461_s19 }
  0x95   : > { %p2780_p5 = pnand %p3474_p2, %p2778_p13  ;;  %p2785_p12 = por %p2784_p11, %p2783_p9 }
  0x97   : > { %p2781_p7 = pneg %p2780_p5  ;;  %p2787_p3 = por %p2786_p1, %p2785_p12 }
  0x99   : > { %p2788_p10 = pnand %p2787_p3, %p2781_p7 }
  0x9b   : > { %2791 = shalt.err (!%p2788_p10)
}
  0x9c   : > { %s2792_s29 = scalar_lea.vmem %s3464_s7, 128  ;;  %s3168_s17 = smov [#allocation5]  }
  0x9d   : > { %p2793_p13 = scmp.ne.s32.totalorder %s3464_s7, %s2792_s29  ;;  %s2797_s1 = sshll.u32 %s3168_s17, 4  ;;  %s2798_s1 = int_to_ptr.vmem [resolvable:$false] %s2797_s1 }
  0x9e   : > { %s2799_s28 = scalar_lea.vmem %s2798_s1, 256  ;;  %p2800_p6 = scmp.lt.s32.totalorder %s3464_s7, %s2798_s1 }
  0x9f   : > { %p2795_p5 = pnand %p2793_p13, %p3474_p2  ;;  %p2801_p8 = scmp.lt.s32.totalorder %s2799_s28, %s2792_s29 }
  0xa1   : > { %p2796_p4 = pneg %p2795_p5  ;;  %p2802_p9 = por %p2801_p8, %p2800_p6 }
  0xa3   : > { %p2803_p11 = pnand %p2802_p9, %p2796_p4 }
  0xa5   : > { %2806 = shalt.err (!%p2803_p11)
}
  0xa6   : > { %2582 = dma.hbm_to_vmem [thread:$0]  (!%p3452_p0), %s3461_s19, 128, %s3464_s7, %s3468_s10  }
  0xa7   : > { %s4120_s22 = sld [smem:[#allocation43_spill]]  ;;  %s683_s29 = scalar_lea.vmem [#allocation8], %s3447_s6 }
  0xa8   : > { %s690_s1 = sshll.u32 %s683_s29, 4  ;;  %s3169_s28 = smov [#allocation13]   ;;  %s3505_s1 = int_to_ptr.vmem [resolvable:$true] %s690_s1 }
  0xa9   : > { %s3507_s18 = sshll.u32 %s3169_s28, 4  ;;  %s4121_s0 = sand.u32 1, %s3161_s21   ;;  %s547_s18 = int_to_ptr.vmem [resolvable:$true] %s3507_s18 }
  0xaa   : > { %s3511_s16 = scalar_lea.sflag [#allocation9], %s4121_s0 }
  0xad   : > { %s3502_s17 = scalar_lea.hbm %s4120_s22, %s3450_s9  ;;  %s2812_s25 = scalar_lea.hbm %s4120_s22, 256 }
  0xae   : > { %s2807_s7 = scalar_lea.hbm %s3502_s17, 128  ;;  %p2813_p8 = scmp.lt.u32.totalorder %s3502_s17, %s4120_s22 }
  0xaf   : > { %p2808_p1 = scmp.ne.s32.totalorder %s3502_s17, %s2807_s7  ;;  %p2814_p4 = scmp.lt.u32.totalorder %s2812_s25, %s2807_s7 }
  0xb0   : > { %p2816_p7 = scmp.lt.u32.totalorder %s2807_s7, %s3502_s17 }
  0xb1   : > { %p2810_p3 = pnand %p2808_p1, %p3474_p2  ;;  %p2815_p10 = por %p2814_p4, %p2813_p8 }
  0xb3   : > { %p2811_p6 = pneg %p2810_p3  ;;  %p2817_p12 = por %p2816_p7, %p2815_p10 }
  0xb5   : > { %p2818_p13 = pnand %p2817_p12, %p2811_p6 }
  0xb7   : > { %2821 = shalt.err (!%p2818_p13)
}
  0xb8   : > { %s2822_s0 = scalar_lea.vmem %s3505_s1, 128  ;;  %s3170_s29 = smov [#allocation8]  }
  0xb9   : > { %p2823_p5 = scmp.ne.s32.totalorder %s3505_s1, %s2822_s0  ;;  %s2827_s28 = sshll.u32 %s3170_s29, 4  ;;  %s2828_s28 = int_to_ptr.vmem [resolvable:$false] %s2827_s28 }
  0xba   : > { %s2829_s5 = scalar_lea.vmem %s2828_s28, 256  ;;  %p2830_p1 = scmp.lt.s32.totalorder %s3505_s1, %s2828_s28 }
  0xbb   : > { %p2825_p9 = pnand %p2823_p5, %p3474_p2  ;;  %p2831_p3 = scmp.lt.s32.totalorder %s2829_s5, %s2822_s0 }
  0xbd   : > { %p2826_p11 = pneg %p2825_p9  ;;  %p2832_p8 = por %p2831_p3, %p2830_p1 }
  0xbf   : > { %p2833_p4 = pnand %p2832_p8, %p2826_p11 }
  0xc1   : > { %2836 = shalt.err (!%p2833_p4)
}
  0xc2   : > { %2588 = dma.hbm_to_vmem [thread:$0]  (!%p3452_p0), %s3502_s17, 128, %s3505_s1, %s3511_s16  }
  0xc3   : > { %s4122_s8 = sld [smem:[#allocation48_spill]]  ;;  %p4123_p10 = scmp.ne.s32.totalorder %s4107_s24, 0 }
  0xc9   : > { %s2837_s19 = scalar_lea.hbm %s4122_s8, 16 }
  0xca   : > { %p2838_p6 = scmp.ne.s32.totalorder %s4122_s8, %s2837_s19  ;;  %p2844_p13 = scmp.lt.u32.totalorder %s2837_s19, %s4122_s8 }
  0xcc   : > { %p2840_p7 = pnand %p2838_p6, %p4123_p10 }
  0xce   : > { %p2841_p12 = pneg %p2840_p7 }
  0xd0   : > { %p2846_p5 = pnand %p2844_p13, %p2841_p12 }
  0xd2   : > { %2849 = shalt.err (!%p2846_p5)
}
  0xd3   : > { %s2850_s28 = scalar_lea.vmem %s547_s18, 16  ;;  %s2857_s17 = scalar_lea.vmem %s547_s18, 32 }
  0xd4   : > { %p2851_p9 = scmp.ne.s32.totalorder %s547_s18, %s2850_s28  ;;  %p2858_p3 = scmp.lt.s32.totalorder %s547_s18, %s547_s18 }
  0xd5   : > { %p2859_p8 = scmp.lt.s32.totalorder %s2857_s17, %s2850_s28 }
  0xd6   : > { %p2853_p11 = pnand %p2851_p9, %p4123_p10 }
  0xd7   : > { %p2860_p4 = por %p2859_p8, %p2858_p3 }
  0xd8   : > { %p2854_p1 = pneg %p2853_p11 }
  0xda   : > { %p2861_p0 = pnand %p2860_p4, %p2854_p1 }
  0xdc   : > { %2864 = shalt.err (!%p2861_p0)
}
  0xdd   : > { %p4124_p6 = scmp.ne.s32.totalorder %s4105_s3, 0  ;;  %s3171_s2 = smov [#allocation16]  }
  0xde   : > { %s570_s7 = sshll.u32 %s3171_s2, 4  ;;  %s3172_s19 = smov [#allocation19]   ;;  %s571_s7 = int_to_ptr.vmem [resolvable:$true] %s570_s7 }
  0xdf   : > { %2560 = dma.hbm_to_vmem [thread:$0]  (!%p4124_p6), %s4122_s8, 16, %s547_s18, [#allocation12]  }
  0xe0   : > { %s598_s12 = sshll.u32 %s3172_s19, 4  ;;  %s2865_s29 = scalar_lea.hbm %s4039_s11, 256  ;;  %s599_s12 = int_to_ptr.vmem [resolvable:$true] %s598_s12 }
  0xe1   : > { %p2866_p0 = scmp.ne.s32.totalorder %s4039_s11, %s2865_s29  ;;  %p2872_p13 = scmp.lt.u32.totalorder %s2865_s29, %s4039_s11 }
  0xe3   : > { %p2868_p7 = pnand %p2866_p0, %p4123_p10 }
  0xe5   : > { %p2869_p12 = pneg %p2868_p7 }
  0xe7   : > { %p2874_p5 = pnand %p2872_p13, %p2869_p12 }
  0xe9   : > { %2877 = shalt.err (!%p2874_p5)
}
  0xea   : > { %s2878_s18 = scalar_lea.vmem %s571_s7, 256  ;;  %p2886_p3 = scmp.lt.s32.totalorder %s571_s7, %s571_s7 }
  0xeb   : > { %p2879_p9 = scmp.ne.s32.totalorder %s571_s7, %s2878_s18  ;;  %p2887_p8 = scmp.lt.s32.totalorder %s2878_s18, %s2878_s18 }
  0xed   : > { %p2881_p11 = pnand %p2879_p9, %p4123_p10  ;;  %p2888_p4 = por %p2887_p8, %p2886_p3 }
  0xef   : > { %p2882_p1 = pneg %p2881_p11 }
  0xf1   : > { %p2889_p2 = pnand %p2888_p4, %p2882_p1 }
  0xf3   : > { %2892 = shalt.err (!%p2889_p2)
}
  0xf4   : > { %s4125_s5 = smov 4   ;;  %s4126_s2 = smov 64  }
  0xf5   : > { %2566 = dma.hbm_to_vmem [thread:$0]  (!%p4124_p6), %s4039_s11, 256, %s571_s7, [#allocation15], %s4126_s2, %s4126_s2, %s4125_s5  }
  0xf6   : > { %s2893_s29 = scalar_lea.hbm %s4042_s14, 16 }
  0xf7   : > { %p2894_p0 = scmp.ne.s32.totalorder %s4042_s14, %s2893_s29  ;;  %p2900_p12 = scmp.lt.u32.totalorder %s2893_s29, %s4042_s14 }
  0xf9   : > { %p2896_p2 = pnand %p2894_p0, %p4123_p10 }
  0xfb   : > { %p2897_p7 = pneg %p2896_p2 }
  0xfd   : > { %p2902_p13 = pnand %p2900_p12, %p2897_p7 }
  0xff   : > { %2905 = shalt.err (!%p2902_p13)
}
 0x100   : > { %s2906_s22 = scalar_lea.vmem %s599_s12, 16  ;;  %s2913_s7 = scalar_lea.vmem %s599_s12, 32 }
 0x101   : > { %p2907_p5 = scmp.ne.s32.totalorder %s599_s12, %s2906_s22  ;;  %p2914_p1 = scmp.lt.s32.totalorder %s599_s12, %s599_s12 }
 0x102   : > { %p2915_p3 = scmp.lt.s32.totalorder %s2913_s7, %s2906_s22 }
 0x103   : > { %p2909_p9 = pnand %p2907_p5, %p4123_p10 }
 0x104   : > { %p2916_p8 = por %p2915_p3, %p2914_p1 }
 0x105   : > { %p2910_p11 = pneg %p2909_p9 }
 0x107   : > { %p2917_p4 = pnand %p2916_p8, %p2910_p11 }
 0x109   : > { %2920 = shalt.err (!%p2917_p4)
}
 0x10a   : > { %2572 = dma.hbm_to_vmem [thread:$0]  (!%p4124_p6), %s4042_s14, 16, %s599_s12, [#allocation18]  }
 0x10b   : > { %s3173_s0 = smov [#allocation20]   ;;  %s2921_s1 = scalar_lea.hbm %s4043_s15, 256 }
 0x10c   : > { %s608_s29 = sshll.u32 %s3173_s0, 4  ;;  %p2922_p0 = scmp.ne.s32.totalorder %s4043_s15, %s2921_s1  ;;  %s609_s29 = int_to_ptr.vmem [resolvable:$true] %s608_s29 }
 0x10d   : > { %p2928_p12 = scmp.lt.u32.totalorder %s2921_s1, %s4043_s15 }
 0x10e   : > { %p2924_p2 = pnand %p2922_p0, %p4123_p10 }
 0x110   : > { %p2925_p7 = pneg %p2924_p2 }
 0x112   : > { %p2930_p13 = pnand %p2928_p12, %p2925_p7 }
 0x114   : > { %2933 = shalt.err (!%p2930_p13)
}
 0x115   : > { %s2934_s12 = scalar_lea.vmem %s609_s29, 256  ;;  %p2942_p1 = scmp.lt.s32.totalorder %s609_s29, %s609_s29 }
 0x116   : > { %p2935_p5 = scmp.ne.s32.totalorder %s609_s29, %s2934_s12  ;;  %p2943_p3 = scmp.lt.s32.totalorder %s2934_s12, %s2934_s12 }
 0x118   : > { %p2937_p9 = pnand %p2935_p5, %p4123_p10  ;;  %p2944_p8 = por %p2943_p3, %p2942_p1 }
 0x11a   : > { %p2938_p11 = pneg %p2937_p9 }
 0x11c   : > { %p2945_p4 = pnand %p2944_p8, %p2938_p11 }
 0x11e   : > { %2948 = shalt.err (!%p2945_p4)
}
 0x11f   : > { %2575 = dma.hbm_to_vmem [thread:$0]  (!%p4124_p6), %s4043_s15, 256, %s609_s29, [#allocation21], %s4126_s2, %s4126_s2, %s4125_s5  }
 0x120   : > { %s4127_s0 = sld [smem:[#allocation40_spill]]  ;;  %s629_s3 = scalar_lea.vmem [#allocation2], %s3447_s6 }
 0x121   : > { %s636_s1 = sshll.u32 %s629_s3, 4  ;;  %s4129_s18 = sand.u32 1, %s3157_s20   ;;  %s637_s1 = int_to_ptr.vmem [resolvable:$true] %s636_s1 }
 0x122   : > { %s626_s22 = scalar_lea.sflag [#allocation3], %s4129_s18  ;;  %p4130_p0 = scmp.ne.s32.totalorder %s4119_s26, 0 }
 0x126   : > { %s4128_s28 = smov %s4127_s0  ;;  %s3618_s17 = scalar_lea.hbm %s4127_s0, %s3450_s9 }
 0x127   : > { %s2949_s7 = scalar_lea.hbm %s3618_s17, 128  ;;  %s2954_s29 = scalar_lea.hbm %s4128_s28, 256 }
 0x128   : > { %p2950_p10 = scmp.ne.s32.totalorder %s3618_s17, %s2949_s7  ;;  %p2955_p6 = scmp.lt.u32.totalorder %s3618_s17, %s4128_s28 }
 0x129   : > { %p2956_p12 = scmp.lt.u32.totalorder %s2954_s29, %s2949_s7  ;;  %p2958_p5 = scmp.lt.u32.totalorder %s2949_s7, %s3618_s17 }
 0x12a   : > { %p2952_p2 = pnand %p2950_p10, %p4130_p0 }
 0x12b   : > { %p2957_p13 = por %p2956_p12, %p2955_p6 }
 0x12c   : > { %p2953_p7 = pneg %p2952_p2 }
 0x12d   : > { %p2959_p9 = por %p2958_p5, %p2957_p13 }
 0x12f   : > { %p2960_p11 = pnand %p2959_p9, %p2953_p7 }
 0x131   : > { %2963 = shalt.err (!%p2960_p11)
}
 0x132   : > { %s2964_s19 = scalar_lea.vmem %s637_s1, 128  ;;  %s3174_s24 = smov [#allocation2]  }
 0x133   : > { %p2965_p1 = scmp.ne.s32.totalorder %s637_s1, %s2964_s19  ;;  %s2969_s25 = sshll.u32 %s3174_s24, 4  ;;  %s2970_s25 = int_to_ptr.vmem [resolvable:$false] %s2969_s25 }
 0x134   : > { %s2971_s0 = scalar_lea.vmem %s2970_s25, 256  ;;  %p2972_p4 = scmp.lt.s32.totalorder %s637_s1, %s2970_s25 }
 0x135   : > { %p2967_p3 = pnand %p2965_p1, %p4130_p0  ;;  %p2973_p10 = scmp.lt.s32.totalorder %s2971_s0, %s2964_s19 }
 0x137   : > { %p2968_p8 = pneg %p2967_p3  ;;  %p2974_p2 = por %p2973_p10, %p2972_p4 }
 0x139   : > { %p2975_p6 = pnand %p2974_p2, %p2968_p8 }
 0x13b   : > { %2978 = shalt.err (!%p2975_p6)
}
 0x13c   : > { %p4131_p12 = scmp.ne.s32.totalorder %s4117_s13, 0  ;;  %s4132_s7 = sld [smem:[#allocation42_spill]] }
 0x13d   : > { %s665_s2 = scalar_lea.vmem [#allocation7], %s3447_s6 }
 0x13e   : > { %2579 = dma.hbm_to_vmem [thread:$0]  (!%p4131_p12), %s3618_s17, 128, %s637_s1, %s626_s22  }
 0x13f   : > { %s672_s29 = sshll.u32 %s665_s2, 4  ;;  %s673_s29 = int_to_ptr.vmem [resolvable:$true] %s672_s29 }
 0x142   : > { %s3644_s5 = scalar_lea.hbm %s4132_s7, %s3450_s9  ;;  %s2984_s17 = scalar_lea.hbm %s4132_s7, 256 }
 0x143   : > { %s2979_s12 = scalar_lea.hbm %s3644_s5, 128  ;;  %p2985_p9 = scmp.lt.u32.totalorder %s3644_s5, %s4132_s7 }
 0x144   : > { %p2980_p7 = scmp.ne.s32.totalorder %s3644_s5, %s2979_s12  ;;  %p2986_p11 = scmp.lt.u32.totalorder %s2984_s17, %s2979_s12 }
 0x145   : > { %p2988_p3 = scmp.lt.u32.totalorder %s2979_s12, %s3644_s5 }
 0x146   : > { %p2982_p13 = pnand %p2980_p7, %p4130_p0  ;;  %p2987_p1 = por %p2986_p11, %p2985_p9 }
 0x148   : > { %p2983_p5 = pneg %p2982_p13  ;;  %p2989_p8 = por %p2988_p3, %p2987_p1 }
 0x14a   : > { %p2990_p4 = pnand %p2989_p8, %p2983_p5 }
 0x14c   : > { %2993 = shalt.err (!%p2990_p4)
}
 0x14d   : > { %s2994_s24 = scalar_lea.vmem %s673_s29, 128  ;;  %s3175_s25 = smov [#allocation7]  }
 0x14e   : > { %p2995_p10 = scmp.ne.s32.totalorder %s673_s29, %s2994_s24  ;;  %s2999_s0 = sshll.u32 %s3175_s25, 4  ;;  %s3000_s0 = int_to_ptr.vmem [resolvable:$false] %s2999_s0 }
 0x14f   : > { %s3001_s3 = scalar_lea.vmem %s3000_s0, 256  ;;  %p3002_p7 = scmp.lt.s32.totalorder %s673_s29, %s3000_s0 }
 0x150   : > { %p2997_p2 = pnand %p2995_p10, %p4130_p0  ;;  %p3003_p13 = scmp.lt.s32.totalorder %s3001_s3, %s2994_s24 }
 0x152   : > { %p2998_p6 = pneg %p2997_p2  ;;  %p3004_p12 = por %p3003_p13, %p3002_p7 }
 0x154   : > { %p3005_p9 = pnand %p3004_p12, %p2998_p6 }
 0x156   : > { %3008 = shalt.err (!%p3005_p9)
}
 0x157   : > { %p4133_p11 = scmp.ne.s32.totalorder %s4117_s13, 0  ;;  %s4134_s4 = sld [smem:[#allocation44_spill]] }
 0x158   : > { %s701_s8 = scalar_lea.vmem [#allocation10], %s3447_s6 }
 0x159   : > { %2585 = dma.hbm_to_vmem [thread:$0]  (!%p4133_p11), %s3644_s5, 128, %s673_s29, %s3468_s10  }
 0x15a   : > { %s708_s19 = sshll.u32 %s701_s8, 4  ;;  %s709_s19 = int_to_ptr.vmem [resolvable:$true] %s708_s19 }
 0x15d   : > { %s3669_s12 = scalar_lea.hbm %s4134_s4, %s3450_s9  ;;  %s3014_s10 = scalar_lea.hbm %s4134_s4, 256 }
 0x15e   : > { %s3009_s17 = scalar_lea.hbm %s3669_s12, 128  ;;  %p3015_p3 = scmp.lt.u32.totalorder %s3669_s12, %s4134_s4 }
 0x15f   : > { %p3010_p12 = scmp.ne.s32.totalorder %s3669_s12, %s3009_s17  ;;  %p3016_p8 = scmp.lt.u32.totalorder %s3014_s10, %s3009_s17 }
 0x160   : > { %p3018_p10 = scmp.lt.u32.totalorder %s3009_s17, %s3669_s12 }
 0x161   : > { %p3012_p5 = pnand %p3010_p12, %p4130_p0  ;;  %p3017_p4 = por %p3016_p8, %p3015_p3 }
 0x163   : > { %p3013_p1 = pneg %p3012_p5  ;;  %p3019_p2 = por %p3018_p10, %p3017_p4 }
 0x165   : > { %p3020_p6 = pnand %p3019_p2, %p3013_p1 }
 0x167   : > { %3023 = shalt.err (!%p3020_p6)
}
 0x168   : > { %s3024_s6 = scalar_lea.vmem %s709_s19, 128  ;;  %s3176_s9 = smov [#allocation10]  }
 0x169   : > { %p3025_p7 = scmp.ne.s32.totalorder %s709_s19, %s3024_s6  ;;  %s3029_s24 = sshll.u32 %s3176_s9, 4  ;;  %s3030_s24 = int_to_ptr.vmem [resolvable:$false] %s3029_s24 }
 0x16a   : > { %s3031_s25 = scalar_lea.vmem %s3030_s24, 256  ;;  %p3032_p12 = scmp.lt.s32.totalorder %s709_s19, %s3030_s24 }
 0x16b   : > { %p3027_p13 = pnand %p3025_p7, %p4130_p0  ;;  %p3033_p5 = scmp.lt.s32.totalorder %s3031_s25, %s3024_s6 }
 0x16d   : > { %p3028_p9 = pneg %p3027_p13  ;;  %p3034_p11 = por %p3033_p5, %p3032_p12 }
 0x16f   : > { %p3035_p3 = pnand %p3034_p11, %p3028_p9 }
 0x171   : > { %3038 = shalt.err (!%p3035_p3)
}
 0x172   : > { %p4135_p8 = scmp.ne.s32.totalorder %s4117_s13, 0  ;;  %p4136_p1 = scmp.ne.s32.totalorder %s4104_s23, 0 }
 0x173   : > { %s3693_s26 = sand.u32 (!%p4136_p1), 1, %s3153_s30   ;;  %p4137_p0 = scmp.ne.s32.totalorder (!%p4136_p1), %s4112_s27, 0 }
 0x174   : > { %2591 = dma.hbm_to_vmem [thread:$0]  (!%p4135_p8), %s3669_s12, 128, %s709_s19, %s3511_s16  }
 0x175   : > { %724 = sbr.rel (%p4136_p1) target bundleno = 3346 (0xd12), region = 92  ;;  %s3696_s0 = sshll.u32 (!%p4136_p1), %s3693_s26, 3 }
 0x176   : > { %s727_s3 = scalar_lea.sflag (!%p4136_p1), [#allocation3], %s3693_s26  ;;  %s730_s18 = scalar_lea.vmem (!%p4136_p1), [#allocation2], %s3696_s0 }
 0x17c   : > { %3112 = dma.done.wait (%p4137_p0), %s727_s3, 128  }
 0x17d   : > { %3114 = vsyncadd (%p4137_p0), %s727_s3, 4294967168  ;;  %s4138_s16 = sld [smem:[#allocation35_spill]]  ;;  %s739_s2 = scalar_lea.vmem [#allocation5], %s3696_s0 }
 0x183   : > { %s735_s23 = sand.u32 1, %s4138_s16  }
 0x184   : > { %s736_s13 = scalar_lea.sflag [#allocation6], %s735_s23 }
 0x185   : > { %3116 = dma.done.wait (%p4137_p0), %s736_s13, 256  }
 0x186   : > { %3118 = vsyncadd (%p4137_p0), %s736_s13, 4294967040  ;;  %s748_s12 = scalar_lea.vmem [#allocation7], %s3696_s0  ;;  %s754_s8 = scalar_lea.sflag [#allocation9], %s735_s23 }
 0x187   : > { %s757_s19 = scalar_lea.vmem [#allocation8], %s3696_s0 }
 0x188   : > { %3120 = dma.done.wait (%p4137_p0), %s754_s8, 256  }
 0x189   : > { %3122 = vsyncadd (%p4137_p0), %s754_s8, 4294967040  ;;  %s766_s17 = scalar_lea.vmem [#allocation10], %s3696_s0  ;;  %p4139_p11 = scmp.eq.s32.totalorder %s4138_s16, 0 }
 0x18b   : > { %3124 = dma.done.wait (%p4139_p11), [#allocation12], 272   ;;  %p4140_p4 = pmov %p4139_p11 }
 0x18d   : > { %3126 = vsyncadd (%p4140_p4), [#allocation12], 4294967024  ;;  %p4141_p10 = pmov %p4140_p4 }
 0x18e   : > { %p4142_p2 = pmov %p4140_p4 }
 0x18f   : > { %3128 = dma.done.wait (%p4141_p10), [#allocation15], 272  }
 0x190   : > { %3130 = vsyncadd (%p4142_p2), [#allocation15], 4294967024  ;;  %p4143_p6 = pmov %p4142_p2 }
 0x191   : > { %p4144_p7 = pmov %p4142_p2 }
 0x192   : > { %3132 = dma.done.wait (%p4143_p6), [#allocation18], 32  }
 0x193   : > { %3134 = vsyncadd (%p4144_p7), [#allocation18], 4294967264  ;;  %p4145_p13 = pmov %p4142_p2 }
 0x194   : > { %p4146_p9 = pmov %p4142_p2 }
 0x195   : > { %3136 = dma.done.wait (%p4145_p13), [#allocation21], 256  }
 0x196   : > { %3138 = vsyncadd (%p4146_p9), [#allocation21], 4294967040  ;;  %v3177_v0 = vmov 0.0   ;;  %vm3178_vm0 = vmmov 0   ;;  %v2665_v1 = vld [vmem:[#allocation11] sm:$0xff]   ;;  %v2666_v2 = vld [vmem:[#allocation11 + $0x8] sm:$0xff]  }
 0x197   : > { %2400 = vmatprep.subr.bf16.mxu1 %v3177_v0  ;;  %2392 = vmatprep.subr.bf16.mxu0 %v3177_v0  ;;  %s4147_s22 = sld [smem:[#allocation45_spill]]  ;;  %v953_v4 = vld [vmem:[%s739_s2] sm:$0xff]  ;;  %vm908_vm1 = vcmask 261120   ;;  %v2668_v7 = vld [vmem:[#allocation16] sm:$0xff]   ;;  %s4148_s9 = sld [smem:[#allocation49_spill]]  ;;  %vm1232_vm2 = vcmask 64512  }
 0x198   : > { %2404 = vmatprep.mubr.msk.bf16.mxu1 %vm3178_vm0, %v3177_v0  ;;  %2396 = vmatprep.mubr.msk.bf16.mxu0 %vm3178_vm0, %v3177_v0  ;;  %v954_v5 = vpack.c.bf16 %v953_v4, %v953_v4  ;;  %v883_v8 = vld [vmem:[%s730_s18] sm:$0xff]  ;;  %v1091_v12 = vld [vmem:[%s757_s19] sm:$0xff]  ;;  %s4149_s23 = sld [smem:[#allocation52_spill]]  ;;  %s4150_s19 = sld [smem:[#allocation46_spill]]  ;;  %vm1342_vm3 = vcmask 1043456   ;;  %vm1893_vm5 = vcmask 130048  }
 0x199   : > { %2401 = vmatpush3.bf16.msra.mxu1 %v2665_v1  ;;  %v884_v9 = vpack.c.bf16 %v883_v8, %v883_v8  ;;  %v2670_v11 = vld [vmem:[#allocation16 + $0x8] sm:$0xff]   ;;  %v1092_v15 = vpack.c.bf16 %v1091_v12, %v1091_v12  ;;  %v2307_v21 = vld [vmem:[#allocation13] ss:$0 sm:$0xff]  ;;  %v2315_v35 = vld [vmem:[#allocation17] ss:$0 sm:$0xff]  ;;  %p878_p12 = scmp.lt.s32.totalorder %s4138_s16, 1 }
 0x19a   : > { %2402 = vmatprep.subr.bf16.mxu1 %v3177_v0  ;;  %v1022_v14 = vld [vmem:[%s748_s12] sm:$0xff]  ;;  %v2319_v51 = vld [vmem:[#allocation19] ss:$0 sm:$0xff]  ;;  %s4151_s29 = sld [smem:[#allocation54_spill]]  ;;  %s2301_s24 = sshll.u32 %s3693_s26, 5  ;;  %vm1895_vm6 = vcmask 195584  }
 0x19b   : > { %v1023_v16 = vpack.c.bf16 %v1022_v14, %v1022_v14  ;;  %v1160_v19 = vld [vmem:[%s766_s17] sm:$0xff]  ;;  %s3179_s17 = smov 120   ;;  %s3847_s25 = scalar_lea.vmem [#allocation23], %s2301_s24 }
 0x19c   : > { %v1161_v20 = vpack.c.bf16 %v1160_v19, %v1160_v19  ;;  %v2311_v37 = vld [vmem:[#allocation14] ss:$0 sm:$0xff]  ;;  %s879_s27 = scalar_select %p878_p12, %s4138_s16, 1 }
 0x19d   : > { %v2667_v3 = vld [vmem:[%s4147_s22] sm:$0xff]   ;;  %v2669_v6 = vld [vmem:[%s4147_s22 + $0x8] sm:$0xff]   ;;  %2403 = vmatpush3.bf16.msra.mxu1 %v2666_v2  ;;  %s3180_s3 = smov 112   ;;  %s3181_s18 = smov 104  }
 0x19e   : > { %2393 = vmatpush3.bf16.msra.mxu0 %v2667_v3  ;;  %2416 = vmatprep.subr.bf16.mxu1 %v3177_v0  ;;  %v2671_v10 = vld [vmem:[%s4148_s9] sm:$0xff]   ;;  %v2672_v13 = vld [vmem:[%s4148_s9 + $0x8] sm:$0xff]   ;;  %s2302_s1 = sshll.u32 %s879_s27, 1  ;;  %s3182_s13 = smov 8  }
 0x19f   : > { %2394 = vmatprep.subr.bf16.mxu0 %v3177_v0  ;;  %v2673_v17 = vld [vmem:[%s4149_s23] sm:$0xff]   ;;  %v2674_v18 = vld [vmem:[%s4149_s23 + $0x8] sm:$0xff]   ;;  %s3183_s2 = smov 16   ;;  %s3184_s12 = smov 24  }
 0x1a0   : > { %2405 = vmatmul.mubr.msk.bf16.vlgmr.msra.gmra.mrb[0].mxu1 %vm908_vm1, %v954_v5  ;;  %v2303_v26 = vld [vmem:[%s4150_s19] ss:$0 sm:$0xff]  ;;  %s881_s6 = scalar_lea.vmem %s4151_s29, %s2302_s1  ;;  %s4154_s8 = sld [smem:[#allocation38_spill]] }
 0x1a1   : > { %2417 = vmatpush3.bf16.msra.mxu1 %v2668_v7  ;;  %2420 = vmatprep.mubr.msk.bf16.mxu1 %vm3178_vm0, %v3177_v0  ;;  %v1229_v61 = vld [vmem:[%s881_s6] sm:$0x3]  ;;  %s2349_s19 = sshll.u32 %s4138_s16, 9  ;;  %s4155_s10 = sld [smem:[#allocation56_spill]] }
 0x1a2   : > { %2395 = vmatpush3.bf16.msra.mxu0 %v2669_v6  ;;  %2418 = vmatprep.subr.bf16.mxu1 %v3177_v0  ;;  %v1230_v2 = vunpack.c.0.s8 %v1229_v61  ;;  %s1971_s29 = scalar_lea.sflag [#allocation24], %s3693_s26  ;;  %s3185_s24 = smov [#allocation23]  }
 0x1a3   : > { %2408 = vmatprep.subr.bf16.mxu0 %v3177_v0 }
 0x1a4   : > { %vm3833_vm4 = vcmp.ne.s32.totalorder %v1230_v2, 0 }
 0x1a5   : > { %2397 = vmatmul.mubr.msk.bf16.vlgmr.msra.gmra.mrb[0].mxu0 %vm908_vm1, %v884_v9  ;;  %2419 = vmatpush3.bf16.msra.mxu1 %v2670_v11 }
 0x1a6   : > { %2409 = vmatpush3.bf16.msra.mxu0 %v2671_v10  ;;  %2412 = vmatprep.mubr.msk.bf16.mxu0 %vm3178_vm0, %v3177_v0  ;;  %p4156_p3 = scmp.ne.s32.totalorder %s4154_s8, 0 }
 0x1a7   : > { %2410 = vmatprep.subr.bf16.mxu0 %v3177_v0  ;;  %2432 = vmatprep.subr.bf16.mxu1 %v3177_v0  ;;  %s3946_s5 = scalar_lea.hbm %s4155_s10, %s2349_s19 }
 0x1a8   : > { %2421 = vmatmul.mubr.msk.bf16.vlgmr.msra.gmra.mrb[4].mxu1 %vm908_vm1, %v1092_v15 }
 0x1a9   : > { %2434 = vmatprep.mubr.msk.bf16.mxu1 %vm3178_vm0, %v3177_v0 }
 0x1aa   : > { %2411 = vmatpush3.bf16.msra.mxu0 %v2672_v13 }
 0x1ab   : > { %2424 = vmatprep.subr.bf16.mxu0 %v3177_v0 }
 0x1ad   : > { %2413 = vmatmul.mubr.msk.bf16.vlgmr.msra.gmra.mrb[4].mxu0 %vm908_vm1, %v1023_v16 }
 0x1ae   : > { %2428 = vmatprep.mubr.msk.bf16.mxu0 %vm3178_vm0, %v3177_v0  ;;  %2425 = vmatpush3.bf16.msra.mxu0 %v2673_v17 }
 0x1af   : > { %2426 = vmatprep.subr.bf16.mxu0 %v3177_v0 }
 0x1b2   : > { %2427 = vmatpush3.bf16.msra.mxu0 %v2674_v18 }
 0x1b3   : > { %2438 = vmatprep.subr.bf16.mxu0 %v3177_v0 }
 0x1b5   : > { %2429 = vmatmul.mubr.msk.bf16.vlgmr.msra.gmra.mrb[8].mxu0 %vm908_vm1, %v1161_v20 }
 0x1b6   : > { %2440 = vmatprep.mubr.msk.bf16.mxu0 %vm3178_vm0, %v3177_v0 }
 0x273   : > { %v1015_v22 = vpop.f32.mrb[0].mxu1 }
 0x274   : > { %v1016_v23 = vadd.f32 %v2307_v21, %v1015_v22  ;;  %v2406_v24 = vpop.f32.mrb[1].mxu1 }
 0x275   : > { %v1018_v25 = vpop.f32.mrb[2].mxu1 }
 0x276   : > { %v3793_v28 = vpack.c.bf16 %v1016_v23, %v1016_v23  ;;  %v2407_v29 = vpop.f32.mrb[3].mxu1 }
 0x278   : > { %v946_v27 = vpop.f32.mrb[0].mxu0  ;;  %1390 = vrot.lane.b32.xlu1 %v3793_v28, %s3179_s17  ;;  %v1237_v33 = vsel %vm1232_vm2, %v3793_v28, 0 }
 0x279   : > { %v2398_v30 = vpop.f32.mrb[1].mxu0  ;;  %v947_v32 = vadd.f32 %v2303_v26, %v946_v27  ;;  %2433 = vmatpush3.bf16.xpose.msra.mxu1 %v1237_v33 }
 0x27a   : > { %v949_v31 = vpop.f32.mrb[2].mxu0  ;;  %2444 = vmatprep.subr.bf16.mxu1 %v3177_v0 }
 0x27b   : > { %v2399_v34 = vpop.f32.mrb[3].mxu0  ;;  %v1153_v36 = vpop.f32.mrb[4].mxu1  ;;  %v3800_v38 = vpack.c.bf16 %v947_v32, %v947_v32 }
 0x27c   : > { %v1154_v39 = vadd.f32 %v2315_v35, %v1153_v36  ;;  %v2422_v40 = vpop.f32.mrb[5].mxu1 }
 0x27d   : > { %v1156_v41 = vpop.f32.mrb[6].mxu1 }
 0x27e   : > { %v3802_v43 = vpack.c.bf16 %v1154_v39, %v1154_v39  ;;  %v2423_v44 = vpop.f32.mrb[7].mxu1 }
 0x280   : > { %v1084_v42 = vpop.f32.mrb[4].mxu0  ;;  %1442 = vrot.lane.b32.xlu1 %v3802_v43, %s3179_s17  ;;  %2435 = vmatmul.mubr.msk.bf16.vlgmr.msra.gmra.mrb[8].mxu1 %vm1232_vm2, %v3800_v38  ;;  %v1283_v49 = vsel %vm1232_vm2, %v3802_v43, 0 }
 0x281   : > { %v1085_v45 = vadd.f32 %v2311_v37, %v1084_v42  ;;  %v2414_v46 = vpop.f32.mrb[5].mxu0  ;;  %2439 = vmatpush3.bf16.xpose.msra.mxu0 %v1283_v49  ;;  %2446 = vmatprep.mubr.msk.bf16.mxu1 %vm3178_vm0, %v3177_v0 }
 0x282   : > { %v1087_v47 = vpop.f32.mrb[6].mxu0  ;;  %2450 = vmatprep.subr.bf16.mxu0 %v3177_v0 }
 0x283   : > { %v3808_v48 = vpack.c.bf16 %v1085_v45, %v1085_v45  ;;  %v2415_v50 = vpop.f32.mrb[7].mxu0 }
 0x285   : > { %1439 = vrot.lane.b32.xlu1 %v3808_v48, %s3179_s17 }
 0x288   : > { %2441 = vmatmul.mubr.msk.bf16.vlgmr.msra.gmra.mrb[12].mxu0 %vm1232_vm2, %v3808_v48  ;;  %v1222_v52 = vpop.f32.mrb[8].mxu0 }
 0x289   : > { %2452 = vmatprep.mubr.msk.bf16.mxu0 %vm3178_vm0, %v3177_v0  ;;  %v1223_v53 = vadd.f32 %v2319_v51, %v1222_v52  ;;  %v2430_v54 = vpop.f32.mrb[9].mxu0 }
 0x28a   : > { %v1225_v55 = vpop.f32.mrb[10].mxu0 }
 0x28b   : > { %v3821_v56 = vpack.c.bf16 %v1223_v53, %v1223_v53  ;;  %v2431_v57 = vpop.f32.mrb[11].mxu0 }
 0x28d   : > { %v1344_v58 = vsel %vm1342_vm3, %v3821_v56, 0 }
 0x28e   : > { %2445 = vmatpush3.bf16.msra.mxu1 %v1344_v58 }
 0x28f   : > { %2456 = vmatprep.subr.bf16.mxu1 %v3177_v0 }
 0x2ea   : > { %v1391_v59 = vpop.permute.xlu1 %1390 }
 0x2eb   : > { %v1396_v60 = vsel %vm1232_vm2, %v1391_v59, 0 }
 0x2ec   : > { %2451 = vmatpush3.bf16.xpose.msra.mxu0 %v1396_v60 }
 0x2ed   : > { %2462 = vmatprep.subr.bf16.mxu0 %v3177_v0 }
 0x2f2   : > { %v1443_v20 = vpop.permute.xlu1 %1442 }
 0x2f3   : > { %v1448_v22 = vsel %vm1232_vm2, %v1443_v20, 0 }
 0x2f7   : > { %v1440_v23 = vpop.permute.xlu1 %1439 }
 0x353   : > { %v1273_v62 = vpop.f32.mrb[8].mxu1 }
 0x354   : > { %v2436_v63 = vpop.f32.mrb[9].mxu1 }
 0x355   : > { %v1276_v1 = vpop.f32.mrb[10].mxu1 }
 0x356   : > { %v2437_v3 = vpop.f32.mrb[11].mxu1 }
 0x35b   : > { %v1319_v5 = vpop.f32.mrb[12].mxu0 }
 0x35c   : > { %v2442_v6 = vpop.f32.mrb[13].mxu0  ;;  %v1325_v7 = vsel %vm3833_vm4, %v1319_v5, %v1273_v62 }
 0x35d   : > { %v1322_v8 = vpop.f32.mrb[14].mxu0  ;;  %v1326_v9 = vsel %vm1232_vm2, %v1325_v7, -inf }
 0x35e   : > { %1327 = vmax.xlane.f32.xlu0 %v1326_v9  ;;  %v2443_v10 = vpop.f32.mrb[15].mxu0 }
 0x3eb   : > { %v1328_v11 = vpop.xlane.xlu0 %1327 }
 0x3ec   : > { %v1329_v12 = vsub.f32 %v1325_v7, %v1328_v11 }
 0x3ee   : > { %v1330_v13 = vmul.f32 1.442695, %v1329_v12 }
 0x3f0   : > { %2677 = vpow2.f32 %v1330_v13 }
 0x3fa   : > { %v2678_v14 = vpop.eup %2677 }
 0x3fb   : > { %v1332_v15 = vsel %vm1232_vm2, %v2678_v14, 0.0 }
 0x3fc   : > { %1333 = vadd.xlane.f32.xlu0 %v1332_v15 }
 0x412   : > { %1387 = vrot.lane.b32.xlu0 %v3800_v38, %s3179_s17 }
 0x489   : > { %v1334_v16 = vpop.xlane.xlu0 %1333 }
 0x48a   : > { %2679 = vrcp.f32 %v1334_v16 }
 0x48d   : > { %v1388_v17 = vpop.permute.xlu0 %1387 }
 0x48e   : > { %2453 = vmatmul.mubr.msk.bf16.vlgmr.msra.gmra.mrb[16].mxu0 %vm1232_vm2, %v1388_v17 }
 0x48f   : > { %2464 = vmatprep.mubr.msk.bf16.mxu0 %vm3178_vm0, %v3177_v0 }
 0x494   : > { %v2680_v18 = vpop.eup %2679 }
 0x495   : > { %v1336_v19 = vmul.f32 %v2680_v18, %v2678_v14 }
 0x497   : > { %1337 = vst.msk [vmem:[%s3847_s25] sm:$0xff] %vm1232_vm2, %v1336_v19  ;;  %v1338_v21 = vpack.c.bf16 %v1336_v19, %v1336_v19 }
 0x499   : > { %2447 = vmatmul.mubr.msk.bf16.vlgmr.msra.gmra.mrb[12].mxu1 %vm1232_vm2, %v1338_v21 }
 0x49a   : > { %2457 = vmatpush3.bf16.xpose.msra.mxu1 %v1448_v22  ;;  %2458 = vmatprep.mubr.msk.bf16.mxu1 %vm3178_vm0, %v3177_v0 }
 0x49b   : > { %2468 = vmatprep.subr.bf16.mxu1 %v3177_v0 }
 0x4a1   : > { %2459 = vmatmul.mubr.msk.bf16.vlgmr.msra.gmra.mrb[16].mxu1 %vm1232_vm2, %v1440_v23 }
 0x4a2   : > { %2470 = vmatprep.mubr.msk.bf16.mxu1 %vm3178_vm0, %v3177_v0 }
 0x561   : > { %v1432_v24 = vpop.f32.mrb[16].mxu0 }
 0x562   : > { %v2454_v25 = vpop.f32.mrb[17].mxu0 }
 0x563   : > { %v1435_v26 = vpop.f32.mrb[18].mxu0 }
 0x564   : > { %v2455_v27 = vpop.f32.mrb[19].mxu0 }
 0x56c   : > { %v3859_v29 = vpop.f32.mrb[12].mxu1 }
 0x56d   : > { %v2448_v30 = vpop.f32.mrb[13].mxu1 }
 0x56e   : > { %v1383_v31 = vpop.f32.mrb[14].mxu1 }
 0x56f   : > { %v2449_v32 = vpop.f32.mrb[15].mxu1 }
 0x574   : > { %v1484_v33 = vpop.f32.mrb[16].mxu1 }
 0x575   : > { %v2460_v34 = vpop.f32.mrb[17].mxu1  ;;  %v1490_v35 = vsel %vm3833_vm4, %v1484_v33, %v1432_v24 }
 0x576   : > { %v1487_v36 = vpop.f32.mrb[18].mxu1  ;;  %v1491_v37 = vsel %vm1232_vm2, %v1490_v35, -inf }
 0x577   : > { %v2461_v39 = vpop.f32.mrb[19].mxu1  ;;  %1492 = vmax.xlane.f32.xlu1 %v1491_v37 }
 0x588   : > { %1506 = vrot.lane.b32.xlu1 %v3821_v56, %s3179_s17  ;;  %s1997_s17 = sshll.u32 %s3847_s25, 4  ;;  %s3948_s17 = int_to_ptr.vmem [resolvable:$true] %s1997_s17 }
 0x589   : > { %s3039_s6 = scalar_lea.vmem %s3948_s17, 512 }
 0x58a   : > { %p3040_p5 = scmp.ne.s32.totalorder %s3948_s17, %s3039_s6 }
 0x58c   : > { %1606 = vrot.lane.b32.xlu1 %v3802_v43, %s3180_s3  ;;  %p3041_p8 = pnand %p3040_p5, %p4156_p3 }
 0x58e   : > { %p3042_p1 = pneg %p3041_p8 }
 0x590   : > { %1554 = vrot.lane.b32.xlu1 %v3800_v38, %s3180_s3 }
 0x594   : > { %1604 = vrot.lane.b32.xlu1 %v3808_v48, %s3180_s3 }
 0x604   : > { %v1493_v40 = vpop.xlane.xlu1 %1492 }
 0x605   : > { %v1494_v41 = vsub.f32 %v1490_v35, %v1493_v40 }
 0x607   : > { %v1495_v42 = vmul.f32 1.442695, %v1494_v41 }
 0x608   : > { %v1507_v44 = vpop.permute.xlu1 %1506 }
 0x609   : > { %2681 = vpow2.f32 %v1495_v42  ;;  %v1512_v45 = vsel %vm1342_vm3, %v1507_v44, 0 }
 0x60a   : > { %2463 = vmatpush3.bf16.msra.mxu0 %v1512_v45 }
 0x60b   : > { %2474 = vmatprep.subr.bf16.mxu0 %v3177_v0 }
 0x60c   : > { %v1607_v52 = vpop.permute.xlu1 %1606 }
 0x60d   : > { %v1612_v58 = vsel %vm1232_vm2, %v1607_v52, 0 }
 0x610   : > { %v1555_v54 = vpop.permute.xlu1 %1554 }
 0x613   : > { %v2682_v46 = vpop.eup %2681 }
 0x614   : > { %v1497_v47 = vsel %vm1232_vm2, %v2682_v46, 0.0  ;;  %v1605_v59 = vpop.permute.xlu1 %1604 }
 0x615   : > { %1498 = vadd.xlane.f32.xlu0 %v1497_v47 }
 0x62b   : > { %1556 = vrot.lane.b32.xlu0 %v3793_v28, %s3180_s3 }
 0x6a2   : > { %v1499_v49 = vpop.xlane.xlu0 %1498 }
 0x6a3   : > { %2683 = vrcp.f32 %v1499_v49 }
 0x6a6   : > { %v1557_v50 = vpop.permute.xlu0 %1556 }
 0x6a7   : > { %v1562_v51 = vsel %vm1232_vm2, %v1557_v50, 0 }
 0x6a8   : > { %2469 = vmatpush3.bf16.xpose.msra.mxu1 %v1562_v51 }
 0x6a9   : > { %2480 = vmatprep.subr.bf16.mxu1 %v3177_v0 }
 0x6ad   : > { %v2684_v53 = vpop.eup %2683 }
 0x6ae   : > { %v1501_v55 = vmul.f32 %v2684_v53, %v2682_v46 }
 0x6af   : > { %2471 = vmatmul.mubr.msk.bf16.vlgmr.msra.gmra.mrb[20].mxu1 %vm1232_vm2, %v1555_v54  ;;  %v2675_v54 = vld [vmem:[#allocation20] sm:$0xff]  }
 0x6b0   : > { %2328 = vst.msk [vmem:[%s3847_s25 + $0x8] sm:$0xff] %vm1232_vm2, %v1501_v55  ;;  %v1504_v57 = vpack.c.bf16 %v1501_v55, %v1501_v55  ;;  %2482 = vmatprep.mubr.msk.bf16.mxu1 %vm3178_vm0, %v3177_v0  ;;  %v2676_v55 = vld [vmem:[#allocation20 + $0x8] sm:$0xff]  }
 0x6b2   : > { %2465 = vmatmul.mubr.msk.bf16.vlgmr.msra.gmra.mrb[20].mxu0 %vm1232_vm2, %v1504_v57 }
 0x6b3   : > { %2475 = vmatpush3.bf16.xpose.msra.mxu0 %v1612_v58  ;;  %2476 = vmatprep.mubr.msk.bf16.mxu0 %vm3178_vm0, %v3177_v0 }
 0x6b4   : > { %2486 = vmatprep.subr.bf16.mxu0 %v3177_v0 }
 0x6ba   : > { %2477 = vmatmul.mubr.msk.bf16.vlgmr.msra.gmra.mrb[24].mxu0 %vm1232_vm2, %v1605_v59 }
 0x6bb   : > { %2488 = vmatprep.mubr.msk.bf16.mxu0 %vm3178_vm0, %v3177_v0 }
 0x782   : > { %v1598_v60 = vpop.f32.mrb[20].mxu1 }
 0x783   : > { %v2472_v61 = vpop.f32.mrb[21].mxu1 }
 0x784   : > { %v1601_v62 = vpop.f32.mrb[22].mxu1 }
 0x785   : > { %v3892_v63 = vpop.f32.mrb[20].mxu0  ;;  %v2473_v1 = vpop.f32.mrb[23].mxu1 }
 0x786   : > { %v2466_v2 = vpop.f32.mrb[21].mxu0 }
 0x787   : > { %v1551_v3 = vpop.f32.mrb[22].mxu0 }
 0x788   : > { %v2467_v5 = vpop.f32.mrb[23].mxu0 }
 0x78d   : > { %v1648_v6 = vpop.f32.mrb[24].mxu0 }
 0x78e   : > { %v2478_v7 = vpop.f32.mrb[25].mxu0  ;;  %v1654_v8 = vsel %vm3833_vm4, %v1648_v6, %v1598_v60 }
 0x78f   : > { %v1651_v9 = vpop.f32.mrb[26].mxu0  ;;  %v1655_v10 = vsel %vm1232_vm2, %v1654_v8, -inf }
 0x790   : > { %1656 = vmax.xlane.f32.xlu1 %v1655_v10  ;;  %v2479_v11 = vpop.f32.mrb[27].mxu0 }
 0x7a1   : > { %1669 = vrot.lane.b32.xlu1 %v3821_v56, %s3180_s3  ;;  %s3043_s3 = sshll.u32 %s3185_s24, 4  ;;  %s3044_s3 = int_to_ptr.vmem [resolvable:$false] %s3043_s3 }
 0x7a2   : > { %p3046_p0 = scmp.lt.s32.totalorder %s3948_s17, %s3044_s3 }
 0x7a5   : > { %1769 = vrot.lane.b32.xlu1 %v3802_v43, %s3181_s18 }
 0x7a9   : > { %1717 = vrot.lane.b32.xlu1 %v3800_v38, %s3181_s18 }
 0x81d   : > { %v1657_v12 = vpop.xlane.xlu1 %1656 }
 0x81e   : > { %v1658_v13 = vsub.f32 %v1654_v8, %v1657_v12 }
 0x820   : > { %v1659_v14 = vmul.f32 1.442695, %v1658_v13 }
 0x821   : > { %v1670_v15 = vpop.permute.xlu1 %1669 }
 0x822   : > { %2685 = vpow2.f32 %v1659_v14  ;;  %v1675_v16 = vsel %vm1342_vm3, %v1670_v15, 0 }
 0x823   : > { %2481 = vmatpush3.bf16.msra.mxu1 %v1675_v16 }
 0x824   : > { %2492 = vmatprep.subr.bf16.mxu1 %v3177_v0 }
 0x825   : > { %v1770_v20 = vpop.permute.xlu1 %1769 }
 0x829   : > { %v1718_v22 = vpop.permute.xlu1 %1717 }
 0x82c   : > { %v2686_v17 = vpop.eup %2685 }
 0x82d   : > { %v1661_v18 = vsel %vm1232_vm2, %v2686_v17, 0.0 }
 0x82e   : > { %1662 = vadd.xlane.f32.xlu0 %v1661_v18 }
 0x844   : > { %1719 = vrot.lane.b32.xlu0 %v3793_v28, %s3181_s18 }
 0x848   : > { %1767 = vrot.lane.b32.xlu0 %v3808_v48, %s3181_s18  ;;  %v1775_v48 = vsel %vm1232_vm2, %v1770_v20, 0 }
 0x8bb   : > { %v1663_v38 = vpop.xlane.xlu0 %1662 }
 0x8bc   : > { %2687 = vrcp.f32 %v1663_v38 }
 0x8bf   : > { %v1720_v43 = vpop.permute.xlu0 %1719 }
 0x8c0   : > { %v1725_v19 = vsel %vm1232_vm2, %v1720_v43, 0 }
 0x8c1   : > { %2487 = vmatpush3.bf16.xpose.msra.mxu0 %v1725_v19 }
 0x8c2   : > { %2498 = vmatprep.subr.bf16.mxu0 %v3177_v0 }
 0x8c3   : > { %v1768_v24 = vpop.permute.xlu0 %1767 }
 0x8c6   : > { %v2688_v21 = vpop.eup %2687 }
 0x8c7   : > { %v1665_v23 = vmul.f32 %v2688_v21, %v2686_v17 }
 0x8c8   : > { %2489 = vmatmul.mubr.msk.bf16.vlgmr.msra.gmra.mrb[28].mxu0 %vm1232_vm2, %v1718_v22 }
 0x8c9   : > { %2332 = vst.msk [vmem:[%s3847_s25 + $0x10] sm:$0xff] %vm1232_vm2, %v1665_v23  ;;  %v1668_v28 = vpack.c.bf16 %v1665_v23, %v1665_v23  ;;  %2500 = vmatprep.mubr.msk.bf16.mxu0 %vm3178_vm0, %v3177_v0 }
 0x8cb   : > { %2483 = vmatmul.mubr.msk.bf16.vlgmr.msra.gmra.mrb[24].mxu1 %vm1232_vm2, %v1668_v28 }
 0x8cc   : > { %2493 = vmatpush3.bf16.xpose.msra.mxu1 %v1775_v48  ;;  %2494 = vmatprep.mubr.msk.bf16.mxu1 %vm3178_vm0, %v3177_v0 }
 0x8cd   : > { %2504 = vmatprep.subr.bf16.mxu1 %v3177_v0 }
 0x8d3   : > { %2495 = vmatmul.mubr.msk.bf16.vlgmr.msra.gmra.mrb[28].mxu1 %vm1232_vm2, %v1768_v24 }
 0x8d4   : > { %2508 = vmatprep.mubr.msk.bf16.mxu1 %vm3178_vm0, %v3177_v0  ;;  %2505 = vmatpush3.bf16.msra.mxu1 %v2675_v54 }
 0x8d5   : > { %2506 = vmatprep.subr.bf16.mxu1 %v3177_v0 }
 0x8d8   : > { %2507 = vmatpush3.bf16.msra.mxu1 %v2676_v55 }
 0x99b   : > { %v1761_v25 = vpop.f32.mrb[28].mxu0 }
 0x99c   : > { %v2490_v26 = vpop.f32.mrb[29].mxu0 }
 0x99d   : > { %v1764_v27 = vpop.f32.mrb[30].mxu0 }
 0x99e   : > { %v1711_v30 = vpop.f32.mrb[24].mxu1  ;;  %v2491_v31 = vpop.f32.mrb[31].mxu0 }
 0x99f   : > { %v2484_v32 = vpop.f32.mrb[25].mxu1 }
 0x9a0   : > { %v1714_v33 = vpop.f32.mrb[26].mxu1 }
 0x9a1   : > { %v2485_v34 = vpop.f32.mrb[27].mxu1 }
 0x9a6   : > { %v1811_v35 = vpop.f32.mrb[28].mxu1 }
 0x9a7   : > { %v2496_v36 = vpop.f32.mrb[29].mxu1  ;;  %v1817_v37 = vsel %vm3833_vm4, %v1811_v35, %v1761_v25 }
 0x9a8   : > { %v1814_v39 = vpop.f32.mrb[30].mxu1  ;;  %v1818_v40 = vsel %vm1232_vm2, %v1817_v37, -inf }
 0x9a9   : > { %v2497_v41 = vpop.f32.mrb[31].mxu1  ;;  %1819 = vmax.xlane.f32.xlu1 %v1818_v40 }
 0x9ba   : > { %1881 = vrot.lane.b32.xlu1 %v3892_v63, %s3182_s13 }
 0x9be   : > { %1885 = vrot.lane.b32.xlu1 %v1711_v30, %s3183_s2 }
 0xa36   : > { %v1820_v42 = vpop.xlane.xlu1 %1819 }
 0xa37   : > { %v1821_v44 = vsub.f32 %v1817_v37, %v1820_v42 }
 0xa39   : > { %v1822_v45 = vmul.f32 1.442695, %v1821_v44 }
 0xa3a   : > { %v1882_v60 = vpop.permute.xlu1 %1881 }
 0xa3b   : > { %2689 = vpow2.f32 %v1822_v45  ;;  %v1892_v62 = vsel %vm1232_vm2, %v3859_v29, %v1882_v60 }
 0xa3e   : > { %v1886_v61 = vpop.permute.xlu1 %1885 }
 0xa3f   : > { %v1894_v0 = vsel %vm1893_vm5, %v1892_v62, %v1886_v61 }
 0xa45   : > { %v2690_v46 = vpop.eup %2689 }
 0xa46   : > { %v1824_v4 = vsel %vm1232_vm2, %v2690_v46, 0.0 }
 0xa47   : > { %1825 = vadd.xlane.f32.xlu0 %v1824_v4 }
 0xa5d   : > { %1832 = vrot.lane.b32.xlu0 %v3821_v56, %s3181_s18 }
 0xad4   : > { %v1826_v47 = vpop.xlane.xlu0 %1825 }
 0xad5   : > { %2691 = vrcp.f32 %v1826_v47 }
 0xad8   : > { %v1833_v49 = vpop.permute.xlu0 %1832 }
 0xad9   : > { %v1838_v50 = vsel %vm1342_vm3, %v1833_v49, 0 }
 0xada   : > { %2499 = vmatpush3.bf16.msra.mxu0 %v1838_v50 }
 0xadf   : > { %v2692_v51 = vpop.eup %2691 }
 0xae0   : > { %v1828_v52 = vmul.f32 %v2692_v51, %v2690_v46 }
 0xae2   : > { %2336 = vst.msk [vmem:[%s3847_s25 + $0x18] sm:$0xff] %vm1232_vm2, %v1828_v52  ;;  %v1831_v53 = vpack.c.bf16 %v1828_v52, %v1828_v52  ;;  %s3045_s25 = scalar_lea.vmem %s3044_s3, 1024 }
 0xae3   : > { %p3047_p11 = scmp.lt.s32.totalorder %s3045_s25, %s3039_s6 }
 0xae4   : > { %2501 = vmatmul.mubr.msk.bf16.vlgmr.msra.gmra.mrb[32].mxu0 %vm1232_vm2, %v1831_v53 }
 0xae5   : > { %p3048_p4 = por %p3047_p11, %p3046_p0 }
 0xae7   : > { %p3049_p10 = pnand %p3048_p4, %p3042_p1 }
 0xbb7   : > { %v1874_v56 = vpop.f32.mrb[32].mxu0 }
 0xbb8   : > { %1889 = vrot.lane.b32.xlu0 %v1874_v56, %s3184_s12  ;;  %v2502_v57 = vpop.f32.mrb[33].mxu0 }
 0xbb9   : > { %v1877_v58 = vpop.f32.mrb[34].mxu0 }
 0xbba   : > { %v2503_v59 = vpop.f32.mrb[35].mxu0 }
 0xc2a   : > { %v1890_v63 = vpop.permute.xlu0 %1889 }
 0xc2b   : > { %v1896_v1 = vsel %vm1895_vm6, %v1894_v0, %v1890_v63 }
 0xc2c   : > { %v1897_v2 = vpack.c.bf16 %v1896_v1, %v1896_v1 }
 0xc2e   : > { %2509 = vmatmul.mubr.msk.bf16.vlgmr.msra.gmra.mrb[32].mxu1 %vm908_vm1, %v1897_v2 }
 0xc2f   : > { %3052 = shalt.err (!%p3049_p10)
}
 0xc30   : > { %s3053_s18 = scalar_lea.hbm %s3946_s5, 512  ;;  %s3057_s19 = scalar_lea.hbm %s4155_s10, 1024 }
 0xc31   : > { %p3054_p2 = scmp.ne.s32.totalorder %s3946_s5, %s3053_s18  ;;  %p3058_p13 = scmp.lt.u32.totalorder %s3946_s5, %s4155_s10 }
 0xc32   : > { %p3059_p9 = scmp.lt.u32.totalorder %s3057_s19, %s3053_s18  ;;  %p3061_p5 = scmp.lt.u32.totalorder %s3053_s18, %s3946_s5 }
 0xc33   : > { %p3055_p6 = pnand %p3054_p2, %p4156_p3 }
 0xc34   : > { %p3060_p12 = por %p3059_p9, %p3058_p13 }
 0xc35   : > { %p3056_p7 = pneg %p3055_p6 }
 0xc36   : > { %p3062_p8 = por %p3061_p5, %p3060_p12 }
 0xc38   : > { %p3063_p1 = pnand %p3062_p8, %p3056_p7 }
 0xc3a   : > { %3066 = shalt.err (!%p3063_p1)
}
 0xc3b   : > { %s3186_s6 = smov 128   ;;  %s4157_s25 = sld [smem:[#allocation53_spill]] }
 0xc3c   : > { %2551 = dma.vmem_to_hbm [thread:$0]  (%p4156_p3), %s3948_s17, 512, %s3946_s5, %s1971_s29, %s3186_s6, %s3186_s6, %s3182_s13  }
 0xc3d   : > { %s2344_s18 = sshll.u32 %s4138_s16, 7  ;;  %s870_s2 = scalar_lea.vmem [#allocation22], %s3696_s0 }
 0xc3e   : > { %s1984_s12 = sshll.u32 %s870_s2, 4  ;;  %s4158_s1 = sld [smem:[#allocation55_spill]]  ;;  %s3985_s12 = int_to_ptr.vmem [resolvable:$true] %s1984_s12 }
 0xc3f   : > { %s1966_s16 = scalar_lea.sflag [#allocation4], %s3693_s26  ;;  %s3067_s0 = scalar_lea.vmem %s3985_s12, 128 }
 0xc40   : > { %p3068_p0 = scmp.ne.s32.totalorder %s3985_s12, %s3067_s0  ;;  %s3187_s13 = smov [#allocation22]  }
 0xc41   : > { %v2338_v29 = vld [vmem:[%s4157_s25] ss:$0 sm:$0xff]  ;;  %s3071_s17 = sshll.u32 %s3187_s13, 4  ;;  %s3072_s17 = int_to_ptr.vmem [resolvable:$false] %s3071_s17 }
 0xc42   : > { %p3069_p11 = pnand %p3068_p0, %p4156_p3  ;;  %s3073_s5 = scalar_lea.vmem %s3072_s17, 256 }
 0xc43   : > { %p3074_p10 = scmp.lt.s32.totalorder %s3985_s12, %s3072_s17  ;;  %p3075_p2 = scmp.lt.s32.totalorder %s3073_s5, %s3067_s0 }
 0xc44   : > { %s3983_s4 = scalar_lea.hbm %s4158_s1, %s2344_s18  ;;  %p3070_p4 = pneg %p3069_p11 }
 0xc45   : > { %p3076_p6 = por %p3075_p2, %p3074_p10 }
 0xc47   : > { %p3077_p7 = pnand %p3076_p6, %p3070_p4 }
 0xd01   : > { %v1958_v3 = vpop.f32.mrb[32].mxu1 }
 0xd02   : > { %v1959_v5 = vadd.f32 %v2338_v29, %v1958_v3  ;;  %v2510_v6 = vpop.f32.mrb[33].mxu1 }
 0xd03   : > { %v1961_v7 = vpop.f32.mrb[34].mxu1 }
 0xd04   : > { %v2511_v8 = vpop.f32.mrb[35].mxu1  ;;  %1964 = vst.msk [vmem:[%s870_s2] sm:$0xff] %vm908_vm1, %v1959_v5 }
 0xd05   : > { %3080 = shalt.err (!%p3077_p7)
}
 0xd06   : > { %s3081_s26 = scalar_lea.hbm %s3983_s4, 128  ;;  %s3085_s24 = scalar_lea.hbm %s4158_s1, 256 }
 0xd07   : > { %p3082_p13 = scmp.ne.s32.totalorder %s3983_s4, %s3081_s26  ;;  %p3086_p5 = scmp.lt.u32.totalorder %s3983_s4, %s4158_s1 }
 0xd08   : > { %p3087_p8 = scmp.lt.u32.totalorder %s3085_s24, %s3081_s26  ;;  %p3089_p0 = scmp.lt.u32.totalorder %s3081_s26, %s3983_s4 }
 0xd09   : > { %p3083_p9 = pnand %p3082_p13, %p4156_p3 }
 0xd0a   : > { %p3088_p1 = por %p3087_p8, %p3086_p5 }
 0xd0b   : > { %p3084_p12 = pneg %p3083_p9 }
 0xd0c   : > { %p3090_p11 = por %p3089_p0, %p3088_p1 }
 0xd0e   : > { %p3091_p4 = pnand %p3090_p11, %p3084_p12 }
 0xd10   : > { %3094 = shalt.err (!%p3091_p4)
}
 0xd11   : > { %2550 = dma.vmem_to_hbm [thread:$0]  (%p4156_p3), %s3985_s12, 128, %s3983_s4, %s1966_s16  }
 0xd12 PF: > { %s4159_s18 = sld [smem:[#allocation34_spill]]  ;;  %s4160_s2 = sld [smem:[#allocation39_spill]] }
 0xd13   : > { %p4162_p2 = scmp.ge.s32.totalorder %s3161_s21, 2 }
 0xd18   : > { %s2012_s19 = sand.u32 1, %s4159_s18   ;;  %p4161_p10 = scmp.ne.s32.totalorder %s4160_s2, 0 }
 0xd19   : > { %s2013_s27 = scalar_lea.sflag [#allocation4], %s2012_s19 }
 0xd1a   : > { %p2593_p6 = pnand %p4162_p2, %p4161_p10 }
 0xd1c   : > { %3140 = dma.done.wait (!%p2593_p6), %s2013_s27, 128  }
 0xd1d   : > { %3142 = vsyncadd (!%p2593_p6), %s2013_s27, 4294967168  ;;  %s2022_s0 = scalar_lea.sflag [#allocation24], %s2012_s19 }
 0xd1e   : > { %3144 = dma.done.wait (!%p2593_p6), %s2022_s0, 512  }
 0xd1f   : > { %3146 = vsyncadd (!%p2593_p6), %s2022_s0, 4294966784  ;;  %s4163_s21 = sld [smem:[#allocation36_spill]]  ;;  %s4164_s8 = sld [smem:[#allocation37_spill]] }
 0xd20   : > { %s4165_s0 = smov %s3153_s30  ;;  %s4166_s30 = smov %s3157_s20 }
 0xd25   : > { %p46_p3 = scmp.ge.s32.totalorder %s4163_s21, 4   ;;  %s4167_s20 = smov %s4164_s8 }
 0xd27   :  { %48 = sbr.rel (!%p46_p3) target bundleno = 33 (0x21), region = 236 }
 0xd2e   :  { %2027 = vsyncpa [#allocation3], 1 }
 0xd2f   :  { %2029 = vsyncpa [#allocation3 + $0x1], 1 }
 0xd30   :  { %2030 = vsyncpa [#allocation6], 1 }
 0xd31   :  { %2032 = vsyncpa [#allocation6 + $0x1], 1 }
 0xd32   :  { %2033 = vsyncpa [#allocation9], 1 }
 0xd33   :  { %2035 = vsyncpa [#allocation9 + $0x1], 1 }
 0xd34   :  { %2036 = vsyncpa [#allocation12], 1 }
 0xd35   :  { %2037 = vsyncpa [#allocation15], 1 }
 0xd36   :  { %2038 = vsyncpa [#allocation18], 1 }
 0xd37   :  { %2039 = vsyncpa [#allocation21], 1 }
 0xd38   :  { %2040 = vsyncpa [#allocation4], 1 }
 0xd39   :  { %2042 = vsyncpa [#allocation4 + $0x1], 1 }
 0xd3a   :  { %2043 = vsyncpa [#allocation24], 1 }
 0xd3b   :  { %2045 = vsyncpa [#allocation24 + $0x1], 1 }

</bundles_post_ra>
